<compile_context>
chip_gen: v7x
topology: tpu7x:2x2x1
jax: 0.10.0
libtpu: 0.0.40
codegen_flags: <defaults>
</compile_context>

<pallas_src>
import math

import jax
import jax.numpy as jnp
from jax.experimental import pallas as pl
from jax.experimental.pallas import tpu as pltpu

# ---------------- configuration (small synthetic shapes) ----------------
B = 2          # batch
S_DEC = 8      # decoder (target) sequence length
S_ENC = 8      # encoder (source) sequence length
EMB = 32       # embedding dim
HEADS = 4      # number of attention heads
HEAD_DIM = EMB // HEADS
FFN = 64       # feed-forward hidden dim
EPS = 1e-6
NEG_BIG = -1e30              # finite mask bias (NaN-safe, unlike -inf)
SCALE = 1.0 / math.sqrt(HEAD_DIM)
BF16 = jnp.bfloat16


# ---------------- in-kernel math helpers (f32 elementwise) ----------------
def _layernorm(x, gamma, beta):
    mu = jnp.mean(x, axis=-1, keepdims=True)
    var = jnp.mean((x - mu) ** 2, axis=-1, keepdims=True)
    return (x - mu) * jax.lax.rsqrt(var + EPS) * gamma + beta


def _softmax_last(x):
    m = jnp.max(x, axis=-1, keepdims=True)
    e = jnp.exp(x - m)
    inv = pl.reciprocal(jnp.sum(e, axis=-1, keepdims=True), approx=True)
    return e * inv


def _attn_core(q3, k3, v3, bias2d, wo_h, bo):
    """Head-batched attention core for one batch element.

    q3: (H, S_q, D) f32,  k3/v3: (H, S_k, D) f32,  bias2d: (S_q, S_k) additive,
    wo_h: (H, D, EMB) bf16,  bo: (1, EMB) f32.   Returns (S_q, EMB) f32.
    """
    # scores for ALL heads in one batched matmul (contract last axes, no .T)
    s = jnp.einsum('hqd,hkd->hqk', q3.astype(BF16), k3.astype(BF16),
                   preferred_element_type=jnp.float32)
    s = s * SCALE + bias2d[None, :, :]
    w = _softmax_last(s)                                   # f32 softmax
    ctx = jnp.einsum('hqk,hkd->hqd', w.astype(BF16), v3.astype(BF16),
                     preferred_element_type=jnp.float32)   # (H, S_q, D)
    # one batched output projection through head-major W_o, then sum heads
    out_h = jnp.einsum('hqd,hde->hqe', ctx.astype(BF16), wo_h,
                       preferred_element_type=jnp.float32)  # (H, S_q, EMB)
    return jnp.sum(out_h, axis=0) + bo


# ---------------- Pallas kernel (one grid step = one batch element) ----------------
def decoder_block_kernel(
    x_ref, k_ref, v_ref, tmask_ref, smask_ref,
    # DecoderBlock self-attention (fused head-major QKV) + LayerNorm
    sa_wqkv_ref, sa_bqkv_ref, sa_wo_ref, sa_bo_ref, ln_g_ref, ln_b_ref,
    # TransformerBlock cross-attention + LayerNorm
    ca_wq_ref, ca_bq_ref, ca_wk_ref, ca_bk_ref, ca_wv_ref, ca_bv_ref,
    ca_wo_ref, ca_bo_ref, ln1_g_ref, ln1_b_ref,
    # TransformerBlock FFN + LayerNorm
    ffn_w1_ref, ffn_b1_ref, ffn_w2_ref, ffn_b2_ref, ln2_g_ref, ln2_b_ref,
    o_ref,
):
    x = x_ref[0]            # (S_DEC, EMB) f32
    enc_k = k_ref[0]        # (S_ENC, EMB) f32
    enc_v = v_ref[0]        # (S_ENC, EMB) f32

    # mask -> additive bias (0/1 float masks, same `== 0` semantics as reference)
    tbias = jnp.where(tmask_ref[0] == 0.0, NEG_BIG, 0.0)   # (S_DEC, S_DEC)
    sbias = jnp.where(smask_ref[0] == 0.0, NEG_BIG, 0.0)   # (S_DEC, S_ENC)

    # --- masked self-attention: one fused head-batched QKV projection ---
    x_bf = x.astype(BF16)
    x_rep = jnp.broadcast_to(x_bf[None], (3 * HEADS, S_DEC, EMB))
    qkv = jnp.einsum('hse,hed->hsd', x_rep, sa_wqkv_ref[...],
                     preferred_element_type=jnp.float32) + sa_bqkv_ref[...]
    sa = _attn_core(qkv[0:HEADS], qkv[HEADS:2 * HEADS], qkv[2 * HEADS:3 * HEADS],
                    tbias, sa_wo_ref[...], sa_bo_ref[...])
    normed = _layernorm(sa + x, ln_g_ref[...], ln_b_ref[...])

    # --- cross-attention (q from decoder, k/v from encoder inputs) ---
    n_bf = normed.astype(BF16)
    q2 = jnp.einsum('hse,hed->hsd',
                    jnp.broadcast_to(n_bf[None], (HEADS, S_DEC, EMB)),
                    ca_wq_ref[...],
                    preferred_element_type=jnp.float32) + ca_bq_ref[...]
    k2 = jnp.einsum('hse,hed->hsd',
                    jnp.broadcast_to(enc_k.astype(BF16)[None], (HEADS, S_ENC, EMB)),
                    ca_wk_ref[...],
                    preferred_element_type=jnp.float32) + ca_bk_ref[...]
    v2 = jnp.einsum('hse,hed->hsd',
                    jnp.broadcast_to(enc_v.astype(BF16)[None], (HEADS, S_ENC, EMB)),
                    ca_wv_ref[...],
                    preferred_element_type=jnp.float32) + ca_bv_ref[...]
    ca = _attn_core(q2, k2, v2, sbias, ca_wo_ref[...], ca_bo_ref[...])
    normed1 = _layernorm(ca + normed, ln1_g_ref[...], ln1_b_ref[...])

    # --- FFN + residual + LayerNorm ---
    h = jnp.dot(normed1.astype(BF16), ffn_w1_ref[...],
                preferred_element_type=jnp.float32) + ffn_b1_ref[...]
    h = jnp.maximum(h, 0.0)
    ffn_out = jnp.dot(h.astype(BF16), ffn_w2_ref[...],
                      preferred_element_type=jnp.float32) + ffn_b2_ref[...]
    o_ref[0] = _layernorm(ffn_out + normed1, ln2_g_ref[...], ln2_b_ref[...])


# ---------------- one-time parameter packing (hoisted out of the call path) ----------------
def pack_params(params):
    (sa_wq, sa_bq, sa_wk, sa_bk, sa_wv, sa_bv, sa_wo, sa_bo,
     ln_g, ln_b,
     ca_wq, ca_bq, ca_wk, ca_bk, ca_wv, ca_bv, ca_wo, ca_bo,
     ln1_g, ln1_b,
     ffn_w1, ffn_b1, ffn_w2, ffn_b2,
     ln2_g, ln2_b) = params

    def heads_w(w):   # (E, E) -> (H, E, D): head-major per-head projection slabs
        return jnp.transpose(w.reshape(EMB, HEADS, HEAD_DIM), (1, 0, 2))

    def heads_b(b):   # (1, E) -> (H, 1, D)
        return jnp.transpose(b.reshape(1, HEADS, HEAD_DIM), (1, 0, 2))

    # fused self-attention QKV: (3H, E, D) bf16 weights, (3H, 1, D) f32 biases
    sa_wqkv = jnp.concatenate(
        [heads_w(sa_wq), heads_w(sa_wk), heads_w(sa_wv)], axis=0).astype(BF16)
    sa_bqkv = jnp.concatenate([heads_b(sa_bq), heads_b(sa_bk), heads_b(sa_bv)], axis=0)
    sa_wo_h = sa_wo.reshape(HEADS, HEAD_DIM, EMB).astype(BF16)

    ca_wq_h = heads_w(ca_wq).astype(BF16)
    ca_wk_h = heads_w(ca_wk).astype(BF16)
    ca_wv_h = heads_w(ca_wv).astype(BF16)
    ca_wo_h = ca_wo.reshape(HEADS, HEAD_DIM, EMB).astype(BF16)

    return (sa_wqkv, sa_bqkv, sa_wo_h, sa_bo, ln_g, ln_b,
            ca_wq_h, heads_b(ca_bq), ca_wk_h, heads_b(ca_bk),
            ca_wv_h, heads_b(ca_bv), ca_wo_h, ca_bo,
            ln1_g, ln1_b,
            ffn_w1.astype(BF16), ffn_b1, ffn_w2.astype(BF16), ffn_b2,
            ln2_g, ln2_b)


# ---------------- wrapper ----------------
def _batch_spec(shape):
    nd = len(shape)
    return pl.BlockSpec((1,) + tuple(shape[1:]),
                        lambda b, nd=nd: (b,) + (0,) * (nd - 1))


def _const_spec(shape):
    nd = len(shape)
    return pl.BlockSpec(tuple(shape), lambda b, nd=nd: (0,) * nd)


def decoder_block(x, key, value, src_mask, tgt_mask, packed):
    Bn, S, E = x.shape

    in_specs = [_batch_spec(x.shape), _batch_spec(key.shape), _batch_spec(value.shape),
                _batch_spec(tgt_mask.shape), _batch_spec(src_mask.shape)]
    in_specs += [_const_spec(p.shape) for p in packed]  # weights resident across grid

    return pl.pallas_call(
        decoder_block_kernel,
        out_shape=jax.ShapeDtypeStruct((Bn, S, E), jnp.float32),
        grid=(Bn,),  # batch-parallel grid: both v7x TensorCores get work
        in_specs=in_specs,
        out_specs=_batch_spec((Bn, S, E)),
        compiler_params=pltpu.CompilerParams(
            dimension_semantics=("parallel",),
        ),
    )(x, key, value, tgt_mask, src_mask, *packed)


# ---------------- pure-JAX reference (f32, module semantics) ----------------
def _ref_forward(x, key, value, src_mask, tgt_mask, params):
    (sa_wq, sa_bq, sa_wk, sa_bk, sa_wv, sa_bv, sa_wo, sa_bo,
     ln_g, ln_b,
     ca_wq, ca_bq, ca_wk, ca_bk, ca_wv, ca_bv, ca_wo, ca_bo,
     ln1_g, ln1_b,
     ffn_w1, ffn_b1, ffn_w2, ffn_b2,
     ln2_g, ln2_b) = params

    def ln(z, g, b):
        mu = jnp.mean(z, -1, keepdims=True)
        var = jnp.mean((z - mu) ** 2, -1, keepdims=True)
        return (z - mu) / jnp.sqrt(var + EPS) * g + b

    def mha(q, k, v, mask, wq, bq, wk, bk, wv, bv, wo, bo):
        Bz, Sq, _ = q.shape
        Skk = k.shape[1]
        Q = (q @ wq + bq).reshape(Bz, Sq, HEADS, HEAD_DIM).transpose(0, 2, 1, 3)
        K = (k @ wk + bk).reshape(Bz, Skk, HEADS, HEAD_DIM).transpose(0, 2, 1, 3)
        V = (v @ wv + bv).reshape(Bz, Skk, HEADS, HEAD_DIM).transpose(0, 2, 1, 3)
        scores = jnp.einsum("bhqd,bhkd->bhqk", Q, K) / math.sqrt(HEAD_DIM)
        scores = jnp.where(mask[:, None, :, :] == 0, -jnp.inf, scores)
        w = jax.nn.softmax(scores, axis=-1)
        out = jnp.einsum("bhqk,bhkd->bhqd", w, V).transpose(0, 2, 1, 3)
        out = out.reshape(Bz, Sq, EMB)
        return out @ wo + bo

    sa = mha(x, x, x, tgt_mask, sa_wq, sa_bq, sa_wk, sa_bk, sa_wv, sa_bv, sa_wo, sa_bo)
    normed = ln(sa + x, ln_g, ln_b)
    ca = mha(normed, key, value, src_mask,
             ca_wq, ca_bq, ca_wk, ca_bk, ca_wv, ca_bv, ca_wo, ca_bo)
    normed1 = ln(ca + normed, ln1_g, ln1_b)
    hdn = jnp.maximum(normed1 @ ffn_w1 + ffn_b1, 0.0)
    ffn = hdn @ ffn_w2 + ffn_b2
    return ln(ffn + normed1, ln2_g, ln2_b)


# ---------------- deterministic parameter init ----------------
def init_params(rng):
    ks = iter(jax.random.split(rng, 32))

    def lin(din, dout):
        w = jax.random.normal(next(ks), (din, dout), jnp.float32) * 0.05
        b = jax.random.normal(next(ks), (1, dout), jnp.float32) * 0.05
        return w, b

    def ln_params(d):
        g = 1.0 + 0.05 * jax.random.normal(next(ks), (1, d), jnp.float32)
        b = 0.05 * jax.random.normal(next(ks), (1, d), jnp.float32)
        return g, b

    sa_wq, sa_bq = lin(EMB, EMB); sa_wk, sa_bk = lin(EMB, EMB)
    sa_wv, sa_bv = lin(EMB, EMB); sa_wo, sa_bo = lin(EMB, EMB)
    ln_g, ln_b = ln_params(EMB)
    ca_wq, ca_bq = lin(EMB, EMB); ca_wk, ca_bk = lin(EMB, EMB)
    ca_wv, ca_bv = lin(EMB, EMB); ca_wo, ca_bo = lin(EMB, EMB)
    ln1_g, ln1_b = ln_params(EMB)
    ffn_w1, ffn_b1 = lin(EMB, FFN); ffn_w2, ffn_b2 = lin(FFN, EMB)
    ln2_g, ln2_b = ln_params(EMB)

    return [sa_wq, sa_bq, sa_wk, sa_bk, sa_wv, sa_bv, sa_wo, sa_bo,
            ln_g, ln_b,
            ca_wq, ca_bq, ca_wk, ca_bk, ca_wv, ca_bv, ca_wo, ca_bo,
            ln1_g, ln1_b,
            ffn_w1, ffn_b1, ffn_w2, ffn_b2,
            ln2_g, ln2_b]


if __name__ == "__main__":
    root = jax.random.PRNGKey(0)
    k_x, k_k, k_v, k_p = jax.random.split(root, 4)

    x = jax.random.normal(k_x, (B, S_DEC, EMB), jnp.float32)
    enc_key = jax.random.normal(k_k, (B, S_ENC, EMB), jnp.float32)
    enc_value = jax.random.normal(k_v, (B, S_ENC, EMB), jnp.float32)

    # causal target mask, broadcast over batch (masks stay module inputs)
    tgt_mask = jnp.broadcast_to(
        jnp.tril(jnp.ones((S_DEC, S_DEC), jnp.float32)), (B, S_DEC, S_DEC))
    # source mask: attend to all but the last encoder position
    src_mask = jnp.ones((B, S_DEC, S_ENC), jnp.float32).at[:, :, -1].set(0.0)

    params = init_params(k_p)
    packed = pack_params(params)          # one-time packing (bf16 weights, head-major)

    out = decoder_block(x, enc_key, enc_value, src_mask, tgt_mask, packed)
    out = jax.block_until_ready(out)

    ref = _ref_forward(x, enc_key, enc_value, src_mask, tgt_mask, params)
    assert out.shape == (B, S_DEC, EMB)
    assert bool(jnp.all(jnp.isfinite(out)))
    assert bool(jnp.allclose(out, ref, atol=5e-2, rtol=5e-2))

    print("KERNEL_OK")
</pallas_src>

<mosaic_0001>
module attributes {stable_mosaic.version = 11 : i64} {
  func.func @decoder_block_kernel(%arg0: i32, %arg1: memref<1x8x32xf32, #tpu.memory_space<vmem>>, %arg2: memref<1x8x32xf32, #tpu.memory_space<vmem>>, %arg3: memref<1x8x32xf32, #tpu.memory_space<vmem>>, %arg4: memref<1x8x8xf32, #tpu.memory_space<vmem>>, %arg5: memref<1x8x8xf32, #tpu.memory_space<vmem>>, %arg6: memref<12x32x8xbf16, #tpu.memory_space<vmem>>, %arg7: memref<12x1x8xf32, #tpu.memory_space<vmem>>, %arg8: memref<4x8x32xbf16, #tpu.memory_space<vmem>>, %arg9: memref<1x32xf32, #tpu.memory_space<vmem>>, %arg10: memref<1x32xf32, #tpu.memory_space<vmem>>, %arg11: memref<1x32xf32, #tpu.memory_space<vmem>>, %arg12: memref<4x32x8xbf16, #tpu.memory_space<vmem>>, %arg13: memref<4x1x8xf32, #tpu.memory_space<vmem>>, %arg14: memref<4x32x8xbf16, #tpu.memory_space<vmem>>, %arg15: memref<4x1x8xf32, #tpu.memory_space<vmem>>, %arg16: memref<4x32x8xbf16, #tpu.memory_space<vmem>>, %arg17: memref<4x1x8xf32, #tpu.memory_space<vmem>>, %arg18: memref<4x8x32xbf16, #tpu.memory_space<vmem>>, %arg19: memref<1x32xf32, #tpu.memory_space<vmem>>, %arg20: memref<1x32xf32, #tpu.memory_space<vmem>>, %arg21: memref<1x32xf32, #tpu.memory_space<vmem>>, %arg22: memref<32x64xbf16, #tpu.memory_space<vmem>>, %arg23: memref<1x64xf32, #tpu.memory_space<vmem>>, %arg24: memref<64x32xbf16, #tpu.memory_space<vmem>>, %arg25: memref<1x32xf32, #tpu.memory_space<vmem>>, %arg26: memref<1x32xf32, #tpu.memory_space<vmem>>, %arg27: memref<1x32xf32, #tpu.memory_space<vmem>>, %arg28: memref<1x8x32xf32, #tpu.memory_space<vmem>>) attributes {dimension_semantics = [#tpu.dimension_semantics<parallel>], iteration_bounds = array<i64: 2>, scalar_prefetch = 0 : i64, scratch_operands = 0 : i64, tpu.core_type = #tpu.core_type<tc>, window_params = [{transform_indices = @transform_0, window_bounds = array<i64: 1, 8, 32>}, {transform_indices = @transform_1, window_bounds = array<i64: 1, 8, 32>}, {transform_indices = @transform_2, window_bounds = array<i64: 1, 8, 32>}, {transform_indices = @transform_3, window_bounds = array<i64: 1, 8, 8>}, {transform_indices = @transform_4, window_bounds = array<i64: 1, 8, 8>}, {pipeline_mode = #tpu.pipeline_mode<synchronous>, transform_indices = @transform_5, window_bounds = array<i64: 12, 32, 8>}, {pipeline_mode = #tpu.pipeline_mode<synchronous>, transform_indices = @transform_6, window_bounds = array<i64: 12, 1, 8>}, {pipeline_mode = #tpu.pipeline_mode<synchronous>, transform_indices = @transform_7, window_bounds = array<i64: 4, 8, 32>}, {pipeline_mode = #tpu.pipeline_mode<synchronous>, transform_indices = @transform_8, window_bounds = array<i64: 1, 32>}, {pipeline_mode = #tpu.pipeline_mode<synchronous>, transform_indices = @transform_9, window_bounds = array<i64: 1, 32>}, {pipeline_mode = #tpu.pipeline_mode<synchronous>, transform_indices = @transform_10, window_bounds = array<i64: 1, 32>}, {pipeline_mode = #tpu.pipeline_mode<synchronous>, transform_indices = @transform_11, window_bounds = array<i64: 4, 32, 8>}, {pipeline_mode = #tpu.pipeline_mode<synchronous>, transform_indices = @transform_12, window_bounds = array<i64: 4, 1, 8>}, {pipeline_mode = #tpu.pipeline_mode<synchronous>, transform_indices = @transform_13, window_bounds = array<i64: 4, 32, 8>}, {pipeline_mode = #tpu.pipeline_mode<synchronous>, transform_indices = @transform_14, window_bounds = array<i64: 4, 1, 8>}, {pipeline_mode = #tpu.pipeline_mode<synchronous>, transform_indices = @transform_15, window_bounds = array<i64: 4, 32, 8>}, {pipeline_mode = #tpu.pipeline_mode<synchronous>, transform_indices = @transform_16, window_bounds = array<i64: 4, 1, 8>}, {pipeline_mode = #tpu.pipeline_mode<synchronous>, transform_indices = @transform_17, window_bounds = array<i64: 4, 8, 32>}, {pipeline_mode = #tpu.pipeline_mode<synchronous>, transform_indices = @transform_18, window_bounds = array<i64: 1, 32>}, {pipeline_mode = #tpu.pipeline_mode<synchronous>, transform_indices = @transform_19, window_bounds = array<i64: 1, 32>}, {pipeline_mode = #tpu.pipeline_mode<synchronous>, transform_indices = @transform_20, window_bounds = array<i64: 1, 32>}, {pipeline_mode = #tpu.pipeline_mode<synchronous>, transform_indices = @transform_21, window_bounds = array<i64: 32, 64>}, {pipeline_mode = #tpu.pipeline_mode<synchronous>, transform_indices = @transform_22, window_bounds = array<i64: 1, 64>}, {pipeline_mode = #tpu.pipeline_mode<synchronous>, transform_indices = @transform_23, window_bounds = array<i64: 64, 32>}, {pipeline_mode = #tpu.pipeline_mode<synchronous>, transform_indices = @transform_24, window_bounds = array<i64: 1, 32>}, {pipeline_mode = #tpu.pipeline_mode<synchronous>, transform_indices = @transform_25, window_bounds = array<i64: 1, 32>}, {pipeline_mode = #tpu.pipeline_mode<synchronous>, transform_indices = @transform_26, window_bounds = array<i64: 1, 32>}, {transform_indices = @transform_27, window_bounds = array<i64: 1, 8, 32>}]} {
    %c0 = arith.constant 0 : index
    %c0_0 = arith.constant 0 : index
    %c0_1 = arith.constant 0 : index
    %0 = vector.load %arg1[%c0, %c0_0, %c0_1] : memref<1x8x32xf32, #tpu.memory_space<vmem>>, vector<1x8x32xf32>
    %1 = vector.shape_cast %0 : vector<1x8x32xf32> to vector<8x32xf32>
    %c0_2 = arith.constant 0 : index
    %c0_3 = arith.constant 0 : index
    %c0_4 = arith.constant 0 : index
    %2 = vector.load %arg2[%c0_2, %c0_3, %c0_4] : memref<1x8x32xf32, #tpu.memory_space<vmem>>, vector<1x8x32xf32>
    %3 = vector.shape_cast %2 : vector<1x8x32xf32> to vector<8x32xf32>
    %c0_5 = arith.constant 0 : index
    %c0_6 = arith.constant 0 : index
    %c0_7 = arith.constant 0 : index
    %4 = vector.load %arg3[%c0_5, %c0_6, %c0_7] : memref<1x8x32xf32, #tpu.memory_space<vmem>>, vector<1x8x32xf32>
    %5 = vector.shape_cast %4 : vector<1x8x32xf32> to vector<8x32xf32>
    %c0_8 = arith.constant 0 : index
    %c0_9 = arith.constant 0 : index
    %c0_10 = arith.constant 0 : index
    %6 = vector.load %arg4[%c0_8, %c0_9, %c0_10] : memref<1x8x8xf32, #tpu.memory_space<vmem>>, vector<1x8x8xf32>
    %7 = vector.shape_cast %6 : vector<1x8x8xf32> to vector<8x8xf32>
    %cst = arith.constant 0.000000e+00 : f32
    %8 = vector.broadcast %cst : f32 to vector<8x8xf32>
    %9 = arith.cmpf oeq, %7, %8 : vector<8x8xf32>
    %cst_11 = arith.constant -1.000000e+30 : f32
    %cst_12 = arith.constant 0.000000e+00 : f32
    %10 = vector.broadcast %cst_11 : f32 to vector<8x8xf32>
    %11 = vector.broadcast %cst_12 : f32 to vector<8x8xf32>
    %12 = arith.select %9, %10, %11 : vector<8x8xi1>, vector<8x8xf32>
    %c0_13 = arith.constant 0 : index
    %c0_14 = arith.constant 0 : index
    %c0_15 = arith.constant 0 : index
    %13 = vector.load %arg5[%c0_13, %c0_14, %c0_15] : memref<1x8x8xf32, #tpu.memory_space<vmem>>, vector<1x8x8xf32>
    %14 = vector.shape_cast %13 : vector<1x8x8xf32> to vector<8x8xf32>
    %cst_16 = arith.constant 0.000000e+00 : f32
    %15 = vector.broadcast %cst_16 : f32 to vector<8x8xf32>
    %16 = arith.cmpf oeq, %14, %15 : vector<8x8xf32>
    %cst_17 = arith.constant -1.000000e+30 : f32
    %cst_18 = arith.constant 0.000000e+00 : f32
    %17 = vector.broadcast %cst_17 : f32 to vector<8x8xf32>
    %18 = vector.broadcast %cst_18 : f32 to vector<8x8xf32>
    %19 = arith.select %16, %17, %18 : vector<8x8xi1>, vector<8x8xf32>
    %20 = arith.truncf %1 : vector<8x32xf32> to vector<8x32xbf16>
    %21 = vector.shape_cast %20 : vector<8x32xbf16> to vector<1x8x32xbf16>
    %22 = vector.shape_cast %21 : vector<1x8x32xbf16> to vector<1x8x32xbf16>
    %23 = vector.broadcast %22 : vector<1x8x32xbf16> to vector<12x8x32xbf16>
    %c0_19 = arith.constant 0 : index
    %c0_20 = arith.constant 0 : index
    %c0_21 = arith.constant 0 : index
    %24 = vector.load %arg6[%c0_19, %c0_20, %c0_21] : memref<12x32x8xbf16, #tpu.memory_space<vmem>>, vector<12x32x8xbf16>
    "tpu.trace_start"() <{level = 10 : i32, message = "hse,hed->hsd"}> : () -> ()
    %cst_22 = arith.constant dense<0.000000e+00> : vector<12x8x8xf32>
    %25 = tpu.matmul %23, %24, %cst_22 {dimension_numbers = #tpu.dot_dimension_numbers<[2], [1], [1], [2], [0, 0, 0, 1, 1, 2], [0], [0]>} : vector<12x8x32xbf16>, vector<12x32x8xbf16>, vector<12x8x8xf32> -> vector<12x8x8xf32>
    "tpu.trace_stop"() : () -> ()
    %c0_23 = arith.constant 0 : index
    %c0_24 = arith.constant 0 : index
    %c0_25 = arith.constant 0 : index
    %26 = vector.load %arg7[%c0_23, %c0_24, %c0_25] : memref<12x1x8xf32, #tpu.memory_space<vmem>>, vector<12x1x8xf32>
    %27 = vector.broadcast %26 : vector<12x1x8xf32> to vector<12x8x8xf32>
    %28 = arith.addf %25, %27 : vector<12x8x8xf32>
    %29 = vector.extract_strided_slice %28 {offsets = [0, 0, 0], sizes = [4, 8, 8], strides = [1, 1, 1]} : vector<12x8x8xf32> to vector<4x8x8xf32>
    %30 = vector.extract_strided_slice %28 {offsets = [4, 0, 0], sizes = [4, 8, 8], strides = [1, 1, 1]} : vector<12x8x8xf32> to vector<4x8x8xf32>
    %31 = vector.extract_strided_slice %28 {offsets = [8, 0, 0], sizes = [4, 8, 8], strides = [1, 1, 1]} : vector<12x8x8xf32> to vector<4x8x8xf32>
    %c0_26 = arith.constant 0 : index
    %c0_27 = arith.constant 0 : index
    %c0_28 = arith.constant 0 : index
    %32 = vector.load %arg8[%c0_26, %c0_27, %c0_28] : memref<4x8x32xbf16, #tpu.memory_space<vmem>>, vector<4x8x32xbf16>
    %c0_29 = arith.constant 0 : index
    %c0_30 = arith.constant 0 : index
    %33 = vector.load %arg9[%c0_29, %c0_30] : memref<1x32xf32, #tpu.memory_space<vmem>>, vector<1x32xf32>
    %34 = arith.truncf %29 : vector<4x8x8xf32> to vector<4x8x8xbf16>
    %35 = arith.truncf %30 : vector<4x8x8xf32> to vector<4x8x8xbf16>
    "tpu.trace_start"() <{level = 10 : i32, message = "hqd,hkd->hqk"}> : () -> ()
    %cst_31 = arith.constant dense<0.000000e+00> : vector<4x8x8xf32>
    %36 = tpu.matmul %34, %35, %cst_31 {dimension_numbers = #tpu.dot_dimension_numbers<[2], [2], [1], [1], [0, 0, 0, 1, 1, 1], [0], [0]>} : vector<4x8x8xbf16>, vector<4x8x8xbf16>, vector<4x8x8xf32> -> vector<4x8x8xf32>
    "tpu.trace_stop"() : () -> ()
    %cst_32 = arith.constant 0.353553385 : f32
    %37 = vector.broadcast %cst_32 : f32 to vector<4x8x8xf32>
    %38 = arith.mulf %36, %37 : vector<4x8x8xf32>
    %39 = vector.shape_cast %12 : vector<8x8xf32> to vector<1x8x8xf32>
    %40 = vector.broadcast %39 : vector<1x8x8xf32> to vector<4x8x8xf32>
    %41 = arith.addf %38, %40 : vector<4x8x8xf32>
    %cst_33 = arith.constant dense<0xFF800000> : vector<4x8xf32>
    %42 = vector.multi_reduction <maximumf>, %41, %cst_33 [2] : vector<4x8x8xf32> to vector<4x8xf32>
    %43 = vector.shape_cast %42 : vector<4x8xf32> to vector<4x8x1xf32>
    %44 = vector.broadcast %43 : vector<4x8x1xf32> to vector<4x8x8xf32>
    %45 = arith.subf %41, %44 : vector<4x8x8xf32>
    %46 = math.exp %45 : vector<4x8x8xf32>
    %cst_34 = arith.constant dense<0.000000e+00> : vector<4x8xf32>
    %47 = vector.multi_reduction <add>, %46, %cst_34 [2] : vector<4x8x8xf32> to vector<4x8xf32>
    %48 = vector.shape_cast %47 : vector<4x8xf32> to vector<4x8x1xf32>
    %49 = tpu.reciprocal %48 {approx = true} : vector<4x8x1xf32> -> vector<4x8x1xf32>
    %50 = vector.broadcast %49 : vector<4x8x1xf32> to vector<4x8x8xf32>
    %51 = arith.mulf %46, %50 : vector<4x8x8xf32>
    %52 = arith.truncf %51 : vector<4x8x8xf32> to vector<4x8x8xbf16>
    %53 = arith.truncf %31 : vector<4x8x8xf32> to vector<4x8x8xbf16>
    "tpu.trace_start"() <{level = 10 : i32, message = "hqk,hkd->hqd"}> : () -> ()
    %cst_35 = arith.constant dense<0.000000e+00> : vector<4x8x8xf32>
    %54 = tpu.matmul %52, %53, %cst_35 {dimension_numbers = #tpu.dot_dimension_numbers<[2], [1], [1], [2], [0, 0, 0, 1, 1, 2], [0], [0]>} : vector<4x8x8xbf16>, vector<4x8x8xbf16>, vector<4x8x8xf32> -> vector<4x8x8xf32>
    "tpu.trace_stop"() : () -> ()
    %55 = arith.truncf %54 : vector<4x8x8xf32> to vector<4x8x8xbf16>
    "tpu.trace_start"() <{level = 10 : i32, message = "hqd,hde->hqe"}> : () -> ()
    %cst_36 = arith.constant dense<0.000000e+00> : vector<4x8x32xf32>
    %56 = tpu.matmul %55, %32, %cst_36 {dimension_numbers = #tpu.dot_dimension_numbers<[2], [1], [1], [2], [0, 0, 0, 1, 1, 2], [0], [0]>} : vector<4x8x8xbf16>, vector<4x8x32xbf16>, vector<4x8x32xf32> -> vector<4x8x32xf32>
    "tpu.trace_stop"() : () -> ()
    %cst_37 = arith.constant dense<0.000000e+00> : vector<8x32xf32>
    %57 = vector.multi_reduction <add>, %56, %cst_37 [0] : vector<4x8x32xf32> to vector<8x32xf32>
    %58 = vector.broadcast %33 : vector<1x32xf32> to vector<8x32xf32>
    %59 = arith.addf %57, %58 : vector<8x32xf32>
    %60 = arith.addf %59, %1 : vector<8x32xf32>
    %c0_38 = arith.constant 0 : index
    %c0_39 = arith.constant 0 : index
    %61 = vector.load %arg10[%c0_38, %c0_39] : memref<1x32xf32, #tpu.memory_space<vmem>>, vector<1x32xf32>
    %c0_40 = arith.constant 0 : index
    %c0_41 = arith.constant 0 : index
    %62 = vector.load %arg11[%c0_40, %c0_41] : memref<1x32xf32, #tpu.memory_space<vmem>>, vector<1x32xf32>
    %cst_42 = arith.constant dense<0.000000e+00> : vector<8xf32>
    %63 = vector.multi_reduction <add>, %60, %cst_42 [1] : vector<8x32xf32> to vector<8xf32>
    %64 = vector.shape_cast %63 : vector<8xf32> to vector<8x1xf32>
    %cst_43 = arith.constant 3.200000e+01 : f32
    %65 = vector.broadcast %cst_43 : f32 to vector<8x1xf32>
    %66 = arith.divf %64, %65 : vector<8x1xf32>
    %67 = vector.broadcast %66 : vector<8x1xf32> to vector<8x32xf32>
    %68 = arith.subf %60, %67 : vector<8x32xf32>
    %69 = arith.mulf %68, %68 : vector<8x32xf32>
    %cst_44 = arith.constant dense<0.000000e+00> : vector<8xf32>
    %70 = vector.multi_reduction <add>, %69, %cst_44 [1] : vector<8x32xf32> to vector<8xf32>
    %71 = vector.shape_cast %70 : vector<8xf32> to vector<8x1xf32>
    %cst_45 = arith.constant 3.200000e+01 : f32
    %72 = vector.broadcast %cst_45 : f32 to vector<8x1xf32>
    %73 = arith.divf %71, %72 : vector<8x1xf32>
    %74 = vector.broadcast %66 : vector<8x1xf32> to vector<8x32xf32>
    %75 = arith.subf %60, %74 : vector<8x32xf32>
    %cst_46 = arith.constant 9.99999997E-7 : f32
    %76 = vector.broadcast %cst_46 : f32 to vector<8x1xf32>
    %77 = arith.addf %73, %76 : vector<8x1xf32>
    %78 = math.rsqrt %77 : vector<8x1xf32>
    %79 = vector.broadcast %78 : vector<8x1xf32> to vector<8x32xf32>
    %80 = arith.mulf %75, %79 : vector<8x32xf32>
    %81 = vector.broadcast %61 : vector<1x32xf32> to vector<8x32xf32>
    %82 = arith.mulf %80, %81 : vector<8x32xf32>
    %83 = vector.broadcast %62 : vector<1x32xf32> to vector<8x32xf32>
    %84 = arith.addf %82, %83 : vector<8x32xf32>
    %85 = arith.truncf %84 : vector<8x32xf32> to vector<8x32xbf16>
    %86 = vector.shape_cast %85 : vector<8x32xbf16> to vector<1x8x32xbf16>
    %87 = vector.shape_cast %86 : vector<1x8x32xbf16> to vector<1x8x32xbf16>
    %88 = vector.broadcast %87 : vector<1x8x32xbf16> to vector<4x8x32xbf16>
    %c0_47 = arith.constant 0 : index
    %c0_48 = arith.constant 0 : index
    %c0_49 = arith.constant 0 : index
    %89 = vector.load %arg12[%c0_47, %c0_48, %c0_49] : memref<4x32x8xbf16, #tpu.memory_space<vmem>>, vector<4x32x8xbf16>
    "tpu.trace_start"() <{level = 10 : i32, message = "hse,hed->hsd"}> : () -> ()
    %cst_50 = arith.constant dense<0.000000e+00> : vector<4x8x8xf32>
    %90 = tpu.matmul %88, %89, %cst_50 {dimension_numbers = #tpu.dot_dimension_numbers<[2], [1], [1], [2], [0, 0, 0, 1, 1, 2], [0], [0]>} : vector<4x8x32xbf16>, vector<4x32x8xbf16>, vector<4x8x8xf32> -> vector<4x8x8xf32>
    "tpu.trace_stop"() : () -> ()
    %c0_51 = arith.constant 0 : index
    %c0_52 = arith.constant 0 : index
    %c0_53 = arith.constant 0 : index
    %91 = vector.load %arg13[%c0_51, %c0_52, %c0_53] : memref<4x1x8xf32, #tpu.memory_space<vmem>>, vector<4x1x8xf32>
    %92 = vector.broadcast %91 : vector<4x1x8xf32> to vector<4x8x8xf32>
    %93 = arith.addf %90, %92 : vector<4x8x8xf32>
    %94 = arith.truncf %3 : vector<8x32xf32> to vector<8x32xbf16>
    %95 = vector.shape_cast %94 : vector<8x32xbf16> to vector<1x8x32xbf16>
    %96 = vector.shape_cast %95 : vector<1x8x32xbf16> to vector<1x8x32xbf16>
    %97 = vector.broadcast %96 : vector<1x8x32xbf16> to vector<4x8x32xbf16>
    %c0_54 = arith.constant 0 : index
    %c0_55 = arith.constant 0 : index
    %c0_56 = arith.constant 0 : index
    %98 = vector.load %arg14[%c0_54, %c0_55, %c0_56] : memref<4x32x8xbf16, #tpu.memory_space<vmem>>, vector<4x32x8xbf16>
    "tpu.trace_start"() <{level = 10 : i32, message = "hse,hed->hsd"}> : () -> ()
    %cst_57 = arith.constant dense<0.000000e+00> : vector<4x8x8xf32>
    %99 = tpu.matmul %97, %98, %cst_57 {dimension_numbers = #tpu.dot_dimension_numbers<[2], [1], [1], [2], [0, 0, 0, 1, 1, 2], [0], [0]>} : vector<4x8x32xbf16>, vector<4x32x8xbf16>, vector<4x8x8xf32> -> vector<4x8x8xf32>
    "tpu.trace_stop"() : () -> ()
    %c0_58 = arith.constant 0 : index
    %c0_59 = arith.constant 0 : index
    %c0_60 = arith.constant 0 : index
    %100 = vector.load %arg15[%c0_58, %c0_59, %c0_60] : memref<4x1x8xf32, #tpu.memory_space<vmem>>, vector<4x1x8xf32>
    %101 = vector.broadcast %100 : vector<4x1x8xf32> to vector<4x8x8xf32>
    %102 = arith.addf %99, %101 : vector<4x8x8xf32>
    %103 = arith.truncf %5 : vector<8x32xf32> to vector<8x32xbf16>
    %104 = vector.shape_cast %103 : vector<8x32xbf16> to vector<1x8x32xbf16>
    %105 = vector.shape_cast %104 : vector<1x8x32xbf16> to vector<1x8x32xbf16>
    %106 = vector.broadcast %105 : vector<1x8x32xbf16> to vector<4x8x32xbf16>
    %c0_61 = arith.constant 0 : index
    %c0_62 = arith.constant 0 : index
    %c0_63 = arith.constant 0 : index
    %107 = vector.load %arg16[%c0_61, %c0_62, %c0_63] : memref<4x32x8xbf16, #tpu.memory_space<vmem>>, vector<4x32x8xbf16>
    "tpu.trace_start"() <{level = 10 : i32, message = "hse,hed->hsd"}> : () -> ()
    %cst_64 = arith.constant dense<0.000000e+00> : vector<4x8x8xf32>
    %108 = tpu.matmul %106, %107, %cst_64 {dimension_numbers = #tpu.dot_dimension_numbers<[2], [1], [1], [2], [0, 0, 0, 1, 1, 2], [0], [0]>} : vector<4x8x32xbf16>, vector<4x32x8xbf16>, vector<4x8x8xf32> -> vector<4x8x8xf32>
    "tpu.trace_stop"() : () -> ()
    %c0_65 = arith.constant 0 : index
    %c0_66 = arith.constant 0 : index
    %c0_67 = arith.constant 0 : index
    %109 = vector.load %arg17[%c0_65, %c0_66, %c0_67] : memref<4x1x8xf32, #tpu.memory_space<vmem>>, vector<4x1x8xf32>
    %110 = vector.broadcast %109 : vector<4x1x8xf32> to vector<4x8x8xf32>
    %111 = arith.addf %108, %110 : vector<4x8x8xf32>
    %c0_68 = arith.constant 0 : index
    %c0_69 = arith.constant 0 : index
    %c0_70 = arith.constant 0 : index
    %112 = vector.load %arg18[%c0_68, %c0_69, %c0_70] : memref<4x8x32xbf16, #tpu.memory_space<vmem>>, vector<4x8x32xbf16>
    %c0_71 = arith.constant 0 : index
    %c0_72 = arith.constant 0 : index
    %113 = vector.load %arg19[%c0_71, %c0_72] : memref<1x32xf32, #tpu.memory_space<vmem>>, vector<1x32xf32>
    %114 = arith.truncf %93 : vector<4x8x8xf32> to vector<4x8x8xbf16>
    %115 = arith.truncf %102 : vector<4x8x8xf32> to vector<4x8x8xbf16>
    "tpu.trace_start"() <{level = 10 : i32, message = "hqd,hkd->hqk"}> : () -> ()
    %cst_73 = arith.constant dense<0.000000e+00> : vector<4x8x8xf32>
    %116 = tpu.matmul %114, %115, %cst_73 {dimension_numbers = #tpu.dot_dimension_numbers<[2], [2], [1], [1], [0, 0, 0, 1, 1, 1], [0], [0]>} : vector<4x8x8xbf16>, vector<4x8x8xbf16>, vector<4x8x8xf32> -> vector<4x8x8xf32>
    "tpu.trace_stop"() : () -> ()
    %cst_74 = arith.constant 0.353553385 : f32
    %117 = vector.broadcast %cst_74 : f32 to vector<4x8x8xf32>
    %118 = arith.mulf %116, %117 : vector<4x8x8xf32>
    %119 = vector.shape_cast %19 : vector<8x8xf32> to vector<1x8x8xf32>
    %120 = vector.broadcast %119 : vector<1x8x8xf32> to vector<4x8x8xf32>
    %121 = arith.addf %118, %120 : vector<4x8x8xf32>
    %cst_75 = arith.constant dense<0xFF800000> : vector<4x8xf32>
    %122 = vector.multi_reduction <maximumf>, %121, %cst_75 [2] : vector<4x8x8xf32> to vector<4x8xf32>
    %123 = vector.shape_cast %122 : vector<4x8xf32> to vector<4x8x1xf32>
    %124 = vector.broadcast %123 : vector<4x8x1xf32> to vector<4x8x8xf32>
    %125 = arith.subf %121, %124 : vector<4x8x8xf32>
    %126 = math.exp %125 : vector<4x8x8xf32>
    %cst_76 = arith.constant dense<0.000000e+00> : vector<4x8xf32>
    %127 = vector.multi_reduction <add>, %126, %cst_76 [2] : vector<4x8x8xf32> to vector<4x8xf32>
    %128 = vector.shape_cast %127 : vector<4x8xf32> to vector<4x8x1xf32>
    %129 = tpu.reciprocal %128 {approx = true} : vector<4x8x1xf32> -> vector<4x8x1xf32>
    %130 = vector.broadcast %129 : vector<4x8x1xf32> to vector<4x8x8xf32>
    %131 = arith.mulf %126, %130 : vector<4x8x8xf32>
    %132 = arith.truncf %131 : vector<4x8x8xf32> to vector<4x8x8xbf16>
    %133 = arith.truncf %111 : vector<4x8x8xf32> to vector<4x8x8xbf16>
    "tpu.trace_start"() <{level = 10 : i32, message = "hqk,hkd->hqd"}> : () -> ()
    %cst_77 = arith.constant dense<0.000000e+00> : vector<4x8x8xf32>
    %134 = tpu.matmul %132, %133, %cst_77 {dimension_numbers = #tpu.dot_dimension_numbers<[2], [1], [1], [2], [0, 0, 0, 1, 1, 2], [0], [0]>} : vector<4x8x8xbf16>, vector<4x8x8xbf16>, vector<4x8x8xf32> -> vector<4x8x8xf32>
    "tpu.trace_stop"() : () -> ()
    %135 = arith.truncf %134 : vector<4x8x8xf32> to vector<4x8x8xbf16>
    "tpu.trace_start"() <{level = 10 : i32, message = "hqd,hde->hqe"}> : () -> ()
    %cst_78 = arith.constant dense<0.000000e+00> : vector<4x8x32xf32>
    %136 = tpu.matmul %135, %112, %cst_78 {dimension_numbers = #tpu.dot_dimension_numbers<[2], [1], [1], [2], [0, 0, 0, 1, 1, 2], [0], [0]>} : vector<4x8x8xbf16>, vector<4x8x32xbf16>, vector<4x8x32xf32> -> vector<4x8x32xf32>
    "tpu.trace_stop"() : () -> ()
    %cst_79 = arith.constant dense<0.000000e+00> : vector<8x32xf32>
    %137 = vector.multi_reduction <add>, %136, %cst_79 [0] : vector<4x8x32xf32> to vector<8x32xf32>
    %138 = vector.broadcast %113 : vector<1x32xf32> to vector<8x32xf32>
    %139 = arith.addf %137, %138 : vector<8x32xf32>
    %140 = arith.addf %139, %84 : vector<8x32xf32>
    %c0_80 = arith.constant 0 : index
    %c0_81 = arith.constant 0 : index
    %141 = vector.load %arg20[%c0_80, %c0_81] : memref<1x32xf32, #tpu.memory_space<vmem>>, vector<1x32xf32>
    %c0_82 = arith.constant 0 : index
    %c0_83 = arith.constant 0 : index
    %142 = vector.load %arg21[%c0_82, %c0_83] : memref<1x32xf32, #tpu.memory_space<vmem>>, vector<1x32xf32>
    %cst_84 = arith.constant dense<0.000000e+00> : vector<8xf32>
    %143 = vector.multi_reduction <add>, %140, %cst_84 [1] : vector<8x32xf32> to vector<8xf32>
    %144 = vector.shape_cast %143 : vector<8xf32> to vector<8x1xf32>
    %cst_85 = arith.constant 3.200000e+01 : f32
    %145 = vector.broadcast %cst_85 : f32 to vector<8x1xf32>
    %146 = arith.divf %144, %145 : vector<8x1xf32>
    %147 = vector.broadcast %146 : vector<8x1xf32> to vector<8x32xf32>
    %148 = arith.subf %140, %147 : vector<8x32xf32>
    %149 = arith.mulf %148, %148 : vector<8x32xf32>
    %cst_86 = arith.constant dense<0.000000e+00> : vector<8xf32>
    %150 = vector.multi_reduction <add>, %149, %cst_86 [1] : vector<8x32xf32> to vector<8xf32>
    %151 = vector.shape_cast %150 : vector<8xf32> to vector<8x1xf32>
    %cst_87 = arith.constant 3.200000e+01 : f32
    %152 = vector.broadcast %cst_87 : f32 to vector<8x1xf32>
    %153 = arith.divf %151, %152 : vector<8x1xf32>
    %154 = vector.broadcast %146 : vector<8x1xf32> to vector<8x32xf32>
    %155 = arith.subf %140, %154 : vector<8x32xf32>
    %cst_88 = arith.constant 9.99999997E-7 : f32
    %156 = vector.broadcast %cst_88 : f32 to vector<8x1xf32>
    %157 = arith.addf %153, %156 : vector<8x1xf32>
    %158 = math.rsqrt %157 : vector<8x1xf32>
    %159 = vector.broadcast %158 : vector<8x1xf32> to vector<8x32xf32>
    %160 = arith.mulf %155, %159 : vector<8x32xf32>
    %161 = vector.broadcast %141 : vector<1x32xf32> to vector<8x32xf32>
    %162 = arith.mulf %160, %161 : vector<8x32xf32>
    %163 = vector.broadcast %142 : vector<1x32xf32> to vector<8x32xf32>
    %164 = arith.addf %162, %163 : vector<8x32xf32>
    %165 = arith.truncf %164 : vector<8x32xf32> to vector<8x32xbf16>
    %c0_89 = arith.constant 0 : index
    %c0_90 = arith.constant 0 : index
    %166 = vector.load %arg22[%c0_89, %c0_90] : memref<32x64xbf16, #tpu.memory_space<vmem>>, vector<32x64xbf16>
    %cst_91 = arith.constant dense<0.000000e+00> : vector<8x64xf32>
    %167 = tpu.matmul %165, %166, %cst_91 {dimension_numbers = #tpu.dot_dimension_numbers<[1], [0], [0], [1], [0, 0, 1, 1], [], []>} : vector<8x32xbf16>, vector<32x64xbf16>, vector<8x64xf32> -> vector<8x64xf32>
    %c0_92 = arith.constant 0 : index
    %c0_93 = arith.constant 0 : index
    %168 = vector.load %arg23[%c0_92, %c0_93] : memref<1x64xf32, #tpu.memory_space<vmem>>, vector<1x64xf32>
    %169 = vector.broadcast %168 : vector<1x64xf32> to vector<8x64xf32>
    %170 = arith.addf %167, %169 : vector<8x64xf32>
    %cst_94 = arith.constant 0.000000e+00 : f32
    %171 = vector.broadcast %cst_94 : f32 to vector<8x64xf32>
    %172 = arith.maximumf %170, %171 : vector<8x64xf32>
    %173 = arith.truncf %172 : vector<8x64xf32> to vector<8x64xbf16>
    %c0_95 = arith.constant 0 : index
    %c0_96 = arith.constant 0 : index
    %174 = vector.load %arg24[%c0_95, %c0_96] : memref<64x32xbf16, #tpu.memory_space<vmem>>, vector<64x32xbf16>
    %cst_97 = arith.constant dense<0.000000e+00> : vector<8x32xf32>
    %175 = tpu.matmul %173, %174, %cst_97 {dimension_numbers = #tpu.dot_dimension_numbers<[1], [0], [0], [1], [0, 0, 1, 1], [], []>} : vector<8x64xbf16>, vector<64x32xbf16>, vector<8x32xf32> -> vector<8x32xf32>
    %c0_98 = arith.constant 0 : index
    %c0_99 = arith.constant 0 : index
    %176 = vector.load %arg25[%c0_98, %c0_99] : memref<1x32xf32, #tpu.memory_space<vmem>>, vector<1x32xf32>
    %177 = vector.broadcast %176 : vector<1x32xf32> to vector<8x32xf32>
    %178 = arith.addf %175, %177 : vector<8x32xf32>
    %179 = arith.addf %178, %164 : vector<8x32xf32>
    %c0_100 = arith.constant 0 : index
    %c0_101 = arith.constant 0 : index
    %180 = vector.load %arg26[%c0_100, %c0_101] : memref<1x32xf32, #tpu.memory_space<vmem>>, vector<1x32xf32>
    %c0_102 = arith.constant 0 : index
    %c0_103 = arith.constant 0 : index
    %181 = vector.load %arg27[%c0_102, %c0_103] : memref<1x32xf32, #tpu.memory_space<vmem>>, vector<1x32xf32>
    %cst_104 = arith.constant dense<0.000000e+00> : vector<8xf32>
    %182 = vector.multi_reduction <add>, %179, %cst_104 [1] : vector<8x32xf32> to vector<8xf32>
    %183 = vector.shape_cast %182 : vector<8xf32> to vector<8x1xf32>
    %cst_105 = arith.constant 3.200000e+01 : f32
    %184 = vector.broadcast %cst_105 : f32 to vector<8x1xf32>
    %185 = arith.divf %183, %184 : vector<8x1xf32>
    %186 = vector.broadcast %185 : vector<8x1xf32> to vector<8x32xf32>
    %187 = arith.subf %179, %186 : vector<8x32xf32>
    %188 = arith.mulf %187, %187 : vector<8x32xf32>
    %cst_106 = arith.constant dense<0.000000e+00> : vector<8xf32>
    %189 = vector.multi_reduction <add>, %188, %cst_106 [1] : vector<8x32xf32> to vector<8xf32>
    %190 = vector.shape_cast %189 : vector<8xf32> to vector<8x1xf32>
    %cst_107 = arith.constant 3.200000e+01 : f32
    %191 = vector.broadcast %cst_107 : f32 to vector<8x1xf32>
    %192 = arith.divf %190, %191 : vector<8x1xf32>
    %193 = vector.broadcast %185 : vector<8x1xf32> to vector<8x32xf32>
    %194 = arith.subf %179, %193 : vector<8x32xf32>
    %cst_108 = arith.constant 9.99999997E-7 : f32
    %195 = vector.broadcast %cst_108 : f32 to vector<8x1xf32>
    %196 = arith.addf %192, %195 : vector<8x1xf32>
    %197 = math.rsqrt %196 : vector<8x1xf32>
    %198 = vector.broadcast %197 : vector<8x1xf32> to vector<8x32xf32>
    %199 = arith.mulf %194, %198 : vector<8x32xf32>
    %200 = vector.broadcast %180 : vector<1x32xf32> to vector<8x32xf32>
    %201 = arith.mulf %199, %200 : vector<8x32xf32>
    %202 = vector.broadcast %181 : vector<1x32xf32> to vector<8x32xf32>
    %203 = arith.addf %201, %202 : vector<8x32xf32>
    %c0_109 = arith.constant 0 : index
    %c0_110 = arith.constant 0 : index
    %c0_111 = arith.constant 0 : index
    %204 = vector.load %arg28[%c0_109, %c0_110, %c0_111] : memref<1x8x32xf32, #tpu.memory_space<vmem>>, vector<1x8x32xf32>
    %205 = vector.shape_cast %204 : vector<1x8x32xf32> to vector<8x32xf32>
    %206 = vector.shape_cast %203 : vector<8x32xf32> to vector<1x8x32xf32>
    tpu.vector_store %arg28[%c0_109, %c0_110, %c0_111], %206 {strides = array<i32>} : memref<1x8x32xf32, #tpu.memory_space<vmem>>, vector<1x8x32xf32>,
    return
  }
  func.func @transform_0(%arg0: i32) -> (i32, i32, i32) {
    %c0_i32 = arith.constant 0 : i32
    %c0_i32_0 = arith.constant 0 : i32
    %c0_i32_1 = arith.constant 0 : i32
    return %arg0, %c0_i32, %c0_i32_0 : i32, i32, i32
  }
  func.func @transform_1(%arg0: i32) -> (i32, i32, i32) {
    %c0_i32 = arith.constant 0 : i32
    %c0_i32_0 = arith.constant 0 : i32
    %c0_i32_1 = arith.constant 0 : i32
    return %arg0, %c0_i32, %c0_i32_0 : i32, i32, i32
  }
  func.func @transform_2(%arg0: i32) -> (i32, i32, i32) {
    %c0_i32 = arith.constant 0 : i32
    %c0_i32_0 = arith.constant 0 : i32
    %c0_i32_1 = arith.constant 0 : i32
    return %arg0, %c0_i32, %c0_i32_0 : i32, i32, i32
  }
  func.func @transform_3(%arg0: i32) -> (i32, i32, i32) {
    %c0_i32 = arith.constant 0 : i32
    %c0_i32_0 = arith.constant 0 : i32
    %c0_i32_1 = arith.constant 0 : i32
    return %arg0, %c0_i32, %c0_i32_0 : i32, i32, i32
  }
  func.func @transform_4(%arg0: i32) -> (i32, i32, i32) {
    %c0_i32 = arith.constant 0 : i32
    %c0_i32_0 = arith.constant 0 : i32
    %c0_i32_1 = arith.constant 0 : i32
    return %arg0, %c0_i32, %c0_i32_0 : i32, i32, i32
  }
  func.func @transform_5(%arg0: i32) -> (i32, i32, i32) {
    %c0_i32 = arith.constant 0 : i32
    %c0_i32_0 = arith.constant 0 : i32
    %c0_i32_1 = arith.constant 0 : i32
    %c0_i32_2 = arith.constant 0 : i32
    return %c0_i32, %c0_i32_0, %c0_i32_1 : i32, i32, i32
  }
  func.func @transform_6(%arg0: i32) -> (i32, i32, i32) {
    %c0_i32 = arith.constant 0 : i32
    %c0_i32_0 = arith.constant 0 : i32
    %c0_i32_1 = arith.constant 0 : i32
    %c0_i32_2 = arith.constant 0 : i32
    return %c0_i32, %c0_i32_0, %c0_i32_1 : i32, i32, i32
  }
  func.func @transform_7(%arg0: i32) -> (i32, i32, i32) {
    %c0_i32 = arith.constant 0 : i32
    %c0_i32_0 = arith.constant 0 : i32
    %c0_i32_1 = arith.constant 0 : i32
    %c0_i32_2 = arith.constant 0 : i32
    return %c0_i32, %c0_i32_0, %c0_i32_1 : i32, i32, i32
  }
  func.func @transform_8(%arg0: i32) -> (i32, i32) {
    %c0_i32 = arith.constant 0 : i32
    %c0_i32_0 = arith.constant 0 : i32
    %c0_i32_1 = arith.constant 0 : i32
    return %c0_i32, %c0_i32_0 : i32, i32
  }
  func.func @transform_9(%arg0: i32) -> (i32, i32) {
    %c0_i32 = arith.constant 0 : i32
    %c0_i32_0 = arith.constant 0 : i32
    %c0_i32_1 = arith.constant 0 : i32
    return %c0_i32, %c0_i32_0 : i32, i32
  }
  func.func @transform_10(%arg0: i32) -> (i32, i32) {
    %c0_i32 = arith.constant 0 : i32
    %c0_i32_0 = arith.constant 0 : i32
    %c0_i32_1 = arith.constant 0 : i32
    return %c0_i32, %c0_i32_0 : i32, i32
  }
  func.func @transform_11(%arg0: i32) -> (i32, i32, i32) {
    %c0_i32 = arith.constant 0 : i32
    %c0_i32_0 = arith.constant 0 : i32
    %c0_i32_1 = arith.constant 0 : i32
    %c0_i32_2 = arith.constant 0 : i32
    return %c0_i32, %c0_i32_0, %c0_i32_1 : i32, i32, i32
  }
  func.func @transform_12(%arg0: i32) -> (i32, i32, i32) {
    %c0_i32 = arith.constant 0 : i32
    %c0_i32_0 = arith.constant 0 : i32
    %c0_i32_1 = arith.constant 0 : i32
    %c0_i32_2 = arith.constant 0 : i32
    return %c0_i32, %c0_i32_0, %c0_i32_1 : i32, i32, i32
  }
  func.func @transform_13(%arg0: i32) -> (i32, i32, i32) {
    %c0_i32 = arith.constant 0 : i32
    %c0_i32_0 = arith.constant 0 : i32
    %c0_i32_1 = arith.constant 0 : i32
    %c0_i32_2 = arith.constant 0 : i32
    return %c0_i32, %c0_i32_0, %c0_i32_1 : i32, i32, i32
  }
  func.func @transform_14(%arg0: i32) -> (i32, i32, i32) {
    %c0_i32 = arith.constant 0 : i32
    %c0_i32_0 = arith.constant 0 : i32
    %c0_i32_1 = arith.constant 0 : i32
    %c0_i32_2 = arith.constant 0 : i32
    return %c0_i32, %c0_i32_0, %c0_i32_1 : i32, i32, i32
  }
  func.func @transform_15(%arg0: i32) -> (i32, i32, i32) {
    %c0_i32 = arith.constant 0 : i32
    %c0_i32_0 = arith.constant 0 : i32
    %c0_i32_1 = arith.constant 0 : i32
    %c0_i32_2 = arith.constant 0 : i32
    return %c0_i32, %c0_i32_0, %c0_i32_1 : i32, i32, i32
  }
  func.func @transform_16(%arg0: i32) -> (i32, i32, i32) {
    %c0_i32 = arith.constant 0 : i32
    %c0_i32_0 = arith.constant 0 : i32
    %c0_i32_1 = arith.constant 0 : i32
    %c0_i32_2 = arith.constant 0 : i32
    return %c0_i32, %c0_i32_0, %c0_i32_1 : i32, i32, i32
  }
  func.func @transform_17(%arg0: i32) -> (i32, i32, i32) {
    %c0_i32 = arith.constant 0 : i32
    %c0_i32_0 = arith.constant 0 : i32
    %c0_i32_1 = arith.constant 0 : i32
    %c0_i32_2 = arith.constant 0 : i32
    return %c0_i32, %c0_i32_0, %c0_i32_1 : i32, i32, i32
  }
  func.func @transform_18(%arg0: i32) -> (i32, i32) {
    %c0_i32 = arith.constant 0 : i32
    %c0_i32_0 = arith.constant 0 : i32
    %c0_i32_1 = arith.constant 0 : i32
    return %c0_i32, %c0_i32_0 : i32, i32
  }
  func.func @transform_19(%arg0: i32) -> (i32, i32) {
    %c0_i32 = arith.constant 0 : i32
    %c0_i32_0 = arith.constant 0 : i32
    %c0_i32_1 = arith.constant 0 : i32
    return %c0_i32, %c0_i32_0 : i32, i32
  }
  func.func @transform_20(%arg0: i32) -> (i32, i32) {
    %c0_i32 = arith.constant 0 : i32
    %c0_i32_0 = arith.constant 0 : i32
    %c0_i32_1 = arith.constant 0 : i32
    return %c0_i32, %c0_i32_0 : i32, i32
  }
  func.func @transform_21(%arg0: i32) -> (i32, i32) {
    %c0_i32 = arith.constant 0 : i32
    %c0_i32_0 = arith.constant 0 : i32
    %c0_i32_1 = arith.constant 0 : i32
    return %c0_i32, %c0_i32_0 : i32, i32
  }
  func.func @transform_22(%arg0: i32) -> (i32, i32) {
    %c0_i32 = arith.constant 0 : i32
    %c0_i32_0 = arith.constant 0 : i32
    %c0_i32_1 = arith.constant 0 : i32
    return %c0_i32, %c0_i32_0 : i32, i32
  }
  func.func @transform_23(%arg0: i32) -> (i32, i32) {
    %c0_i32 = arith.constant 0 : i32
    %c0_i32_0 = arith.constant 0 : i32
    %c0_i32_1 = arith.constant 0 : i32
    return %c0_i32, %c0_i32_0 : i32, i32
  }
  func.func @transform_24(%arg0: i32) -> (i32, i32) {
    %c0_i32 = arith.constant 0 : i32
    %c0_i32_0 = arith.constant 0 : i32
    %c0_i32_1 = arith.constant 0 : i32
    return %c0_i32, %c0_i32_0 : i32, i32
  }
  func.func @transform_25(%arg0: i32) -> (i32, i32) {
    %c0_i32 = arith.constant 0 : i32
    %c0_i32_0 = arith.constant 0 : i32
    %c0_i32_1 = arith.constant 0 : i32
    return %c0_i32, %c0_i32_0 : i32, i32
  }
  func.func @transform_26(%arg0: i32) -> (i32, i32) {
    %c0_i32 = arith.constant 0 : i32
    %c0_i32_0 = arith.constant 0 : i32
    %c0_i32_1 = arith.constant 0 : i32
    return %c0_i32, %c0_i32_0 : i32, i32
  }
  func.func @transform_27(%arg0: i32) -> (i32, i32, i32) {
    %c0_i32 = arith.constant 0 : i32
    %c0_i32_0 = arith.constant 0 : i32
    %c0_i32_1 = arith.constant 0 : i32
    return %arg0, %c0_i32, %c0_i32_0 : i32, i32, i32
  }
}

</mosaic_0001>

<bundles_post_ra>
// kernel: tpu_custom_call.1
= control target key start
LH: loop header
LB: loop body
LE: loop exit
PB: predicated region body
PF: predicated region fallthrough
CT: control target
= control target key end

     0   :  { %s5777_s0 = inlined_call_operand.vmem [shape: f32[2,8,32], index: 0, kind: input, shape index: {}]   ;;  %s5778_s1 = inlined_call_operand.vmem [shape: f32[2,8,32], index: 1, kind: input, shape index: {}]   ;;  %s5779_s2 = inlined_call_operand.vmem [shape: f32[2,8,32], index: 2, kind: input, shape index: {}]   ;;  %s5780_s3 = inlined_call_operand.vmem [shape: f32[2,8,8], index: 3, kind: input, shape index: {}]   ;;  %s5781_s4 = inlined_call_operand.vmem [shape: f32[2,8,8], index: 4, kind: input, shape index: {}]   ;;  %s5782_s5 = inlined_call_operand.vmem [shape: bf16[12,32,8], index: 5, kind: input, shape index: {}]   ;;  %s5783_s6 = inlined_call_operand.vmem [shape: f32[12,1,8], index: 6, kind: input, shape index: {}]   ;;  %s5784_s7 = inlined_call_operand.vmem [shape: bf16[4,8,32], index: 7, kind: input, shape index: {}]   ;;  %s5785_s8 = inlined_call_operand.vmem [shape: f32[1,32], index: 8, kind: input, shape index: {}]   ;;  %s5786_s9 = inlined_call_operand.vmem [shape: f32[1,32], index: 9, kind: input, shape index: {}]   ;;  %s5787_s10 = inlined_call_operand.vmem [shape: f32[1,32], index: 10, kind: input, shape index: {}]   ;;  %s5788_s11 = inlined_call_operand.vmem [shape: bf16[4,32,8], index: 11, kind: input, shape index: {}]   ;;  %s5789_s12 = inlined_call_operand.vmem [shape: f32[4,1,8], index: 12, kind: input, shape index: {}]   ;;  %s5790_s13 = inlined_call_operand.vmem [shape: bf16[4,32,8], index: 13, kind: input, shape index: {}]   ;;  %s5791_s14 = inlined_call_operand.vmem [shape: f32[4,1,8], index: 14, kind: input, shape index: {}]   ;;  %s5792_s15 = inlined_call_operand.vmem [shape: bf16[4,32,8], index: 15, kind: input, shape index: {}]   ;;  %s5793_s16 = inlined_call_operand.vmem [shape: f32[4,1,8], index: 16, kind: input, shape index: {}]   ;;  %s5794_s17 = inlined_call_operand.vmem [shape: bf16[4,8,32], index: 17, kind: input, shape index: {}]   ;;  %s5795_s18 = inlined_call_operand.vmem [shape: f32[1,32], index: 18, kind: input, shape index: {}]   ;;  %s5796_s19 = inlined_call_operand.vmem [shape: f32[1,32], index: 19, kind: input, shape index: {}]   ;;  %s5797_s20 = inlined_call_operand.vmem [shape: f32[1,32], index: 20, kind: input, shape index: {}]   ;;  %s5798_s21 = inlined_call_operand.vmem [shape: bf16[32,64], index: 21, kind: input, shape index: {}]   ;;  %s5799_s22 = inlined_call_operand.vmem [shape: f32[1,64], index: 22, kind: input, shape index: {}]   ;;  %s5800_s23 = inlined_call_operand.vmem [shape: bf16[64,32], index: 23, kind: input, shape index: {}]   ;;  %s5801_s24 = inlined_call_operand.vmem [shape: f32[1,32], index: 24, kind: input, shape index: {}]   ;;  %s5802_s25 = inlined_call_operand.vmem [shape: f32[1,32], index: 25, kind: input, shape index: {}]   ;;  %s5803_s26 = inlined_call_operand.vmem [shape: f32[1,32], index: 26, kind: input, shape index: {}]   ;;  %s5804_s27 = inlined_call_operand.hbm [shape: f32[2,8,32], index: 27, kind: output, shape index: {}]  }
   0x1   :  { %5819 = sst [smem:[#allocation11_spill]] %s5777_s0 }
   0x2   :  { %5820 = sst [smem:[#allocation12_spill]] %s5778_s1 }
   0x3   :  { %5821 = sst [smem:[#allocation13_spill]] %s5779_s2 }
   0x4   :  { %5822 = sst [smem:[#allocation14_spill]] %s5780_s3 }
   0x5   :  { %5823 = sst [smem:[#allocation15_spill]] %s5781_s4 }
   0x6   :  { %5824 = sst [smem:[#allocation16_spill]] %s5782_s5 }
   0x7   :  { %5825 = sst [smem:[#allocation17_spill]] %s5783_s6 }
   0x8   :  { %5826 = sst [smem:[#allocation18_spill]] %s5784_s7 }
   0x9   :  { %5827 = sst [smem:[#allocation19_spill]] %s5785_s8 }
   0xa   :  { %5828 = sst [smem:[#allocation20_spill]] %s5786_s9 }
   0xb   :  { %5829 = sst [smem:[#allocation21_spill]] %s5787_s10 }
   0xc   :  { %5830 = sst [smem:[#allocation22_spill]] %s5788_s11 }
   0xd   :  { %32 = vsyncpa [#allocation3], 0 }
   0xe   :  { %34 = vsyncpa [#allocation3 + $0x1], 0  ;;  %s5050_s7 = smov 0   ;;  %s5052_s4 = smov 0  }
   0xf   :  { %s5054_s8 = smov 0   ;;  %s5056_s30 = smov 0  }
  0x10 LB: > { %5831 = sst [smem:[#allocation5_spill]] %s4893_s7  ;;  %s5071_s9 = sadd.s32 4294967295, %s4905_s30   ;;  %s4905_s30 = sphi %s5056_s30, %s5855_s30   ;;  %s4901_s8 = sphi %s5054_s8, %s5860_s8   ;;  %s4897_s4 = sphi %s5052_s4, %s5859_s4   ;;  %s4893_s7 = sphi %s5050_s7, %s5858_s7  }
  0x11   : > { %5832 = sst [smem:[#allocation6_spill]] %s4901_s8  ;;  %s4074_s5 = sadd.s32 4294967294, %s4905_s30  }
  0x12   : > { %5833 = sst [smem:[#allocation7_spill]] %s4905_s30  ;;  %s5075_s28 = sadd.s32 1, %s4905_s30  }
  0x13   : > { %5834 = sst [smem:[#allocation8_spill]] %s5075_s28  ;;  %s639_s0 = sadd.s32 1, %s4901_s8 }
  0x14   : > { %s636_s10 = ssub.s32 %s4905_s30, %s5075_s28  ;;  %p649_p0 = scmp.ne.s32.totalorder %s4901_s8, %s4897_s4 }
  0x15   : > { %p637_p1 = scmp.eq.s32.totalorder %s636_s10, 0  ;;  %p650_p2 = scmp.eq.s32.totalorder %s5071_s9, 1 }
  0x16   : > { %p655_p3 = scmp.ne.s32.totalorder %s4897_s4, %s4893_s7  ;;  %p656_p4 = scmp.eq.s32.totalorder %s4074_s5, 1 }
  0x17   : > { %s5086_s29 = scalar_select %p637_p1, %s4901_s8, %s639_s0  }
  0x18   : > { %p5088_p5 = por %p650_p2, %p649_p0  ;;  %p5092_p6 = por %p656_p4, %p655_p3 }
  0x19   : > { %5835 = sst [smem:[#allocation9_spill]] %s5086_s29  ;;  %p4077_p7 = scmp.ge.s32.totalorder %s4905_s30, 1 }
  0x1a   : > { %s5837_s6 = scalar_select %p5092_p6, 1, 0 }
  0x1b   : > { %p775_p8 = scmp.lt.s32.totalorder %s4905_s30, 3 }
  0x1c   : > { %5838 = sst [smem:[#allocation10_spill]] %s5837_s6 }
  0x1d   : > { %p776_p9 = pnand %p4077_p7, %p775_p8 }
  0x1e   : > { %s5839_s3 = sld [smem:[#allocation16_spill]] (!%p776_p9)  ;;  %v4907_v1 = vmov (!%p776_p9), 0.0   ;;  %vm4908_vm0 = vmmov (!%p776_p9), 0   ;;  %p862_p10 = scmp.lt.s32.totalorder (!%p776_p9), %s5071_s9, 1  ;;  %vm1037_vm1 = vcmask (!%p776_p9), 261120   ;;  %vm1666_vm2 = vcmask (!%p776_p9), 64512  }
  0x1f   : > { %779 = sbr.rel (%p776_p9) target bundleno = 3869 (0xf1d), region = 128  ;;  %4354 = vmatprep.subr.bf16.mxu0 (!%p776_p9), %v4907_v1  ;;  %4362 = vmatprep.subr.bf16.mxu1 (!%p776_p9), %v4907_v1  ;;  %s5840_s6 = sld [smem:[#allocation11_spill]] (!%p776_p9)  ;;  %vm1914_vm3 = vcmask (!%p776_p9), 1043456   ;;  %vm3878_vm6 = vcmask (!%p776_p9), 523264  }
  0x20   : > { %4358 = vmatprep.mubr.msk.bf16.mxu0 (!%p776_p9), %vm4908_vm0, %v4907_v1  ;;  %4366 = vmatprep.mubr.msk.bf16.mxu1 (!%p776_p9), %vm4908_vm0, %v4907_v1  ;;  %s5841_s7 = sld [smem:[#allocation17_spill]] (!%p776_p9)  ;;  %s5843_s2 = sld [smem:[#allocation14_spill]] (!%p776_p9) }
  0x21   : > { %s5845_s28 = sld [smem:[#allocation19_spill]] (!%p776_p9)  ;;  %s5846_s0 = sld [smem:[#allocation22_spill]] (!%p776_p9) }
  0x22   : > { %s5847_s10 = sld [smem:[#allocation20_spill]] (!%p776_p9)  ;;  %s5850_s30 = sld [smem:[#allocation13_spill]] (!%p776_p9) }
  0x24   : > { %v4751_v0 = vld [vmem:[%s5839_s3] sm:$0xff] (!%p776_p9)   ;;  %v4752_v2 = vld [vmem:[%s5839_s3 + $0x10] sm:$0xff] (!%p776_p9)   ;;  %v4753_v3 = vld [vmem:[%s5839_s3 + $0x8] sm:$0xff] (!%p776_p9)  }
  0x25   : > { %4355 = vmatpush3.bf16.msra.mxu0 (!%p776_p9), %v4751_v0  ;;  %4363 = vmatpush3.bf16.msra.mxu1 (!%p776_p9), %v4752_v2  ;;  %v4754_v4 = vld [vmem:[%s5839_s3 + $0x18] sm:$0xff] (!%p776_p9)   ;;  %v4755_v5 = vld [vmem:[%s5839_s3 + $0x20] sm:$0xff] (!%p776_p9)   ;;  %v4756_v6 = vld [vmem:[%s5839_s3 + $0x30] sm:$0xff] (!%p776_p9)  }
  0x26   : > { %4356 = vmatprep.subr.bf16.mxu0 %v4907_v1  ;;  %4364 = vmatprep.subr.bf16.mxu1 %v4907_v1  ;;  %s863_s5 = scalar_select %p862_p10, %s5071_s9, 1  ;;  %v4757_v9 = vld [vmem:[%s5839_s3 + $0x28] sm:$0xff]   ;;  %v4758_v10 = vld [vmem:[%s5839_s3 + $0x38] sm:$0xff]   ;;  %v4759_v11 = vld [vmem:[%s5839_s3 + $0x40] sm:$0xff]  }
  0x27   : > { %v4760_v12 = vld [vmem:[%s5839_s3 + $0x50] sm:$0xff]   ;;  %v4761_v13 = vld [vmem:[%s5839_s3 + $0x48] sm:$0xff]   ;;  %v4762_v14 = vld [vmem:[%s5839_s3 + $0x58] sm:$0xff]  }
  0x28   : > { %s5120_s29 = sshll.u32 %s863_s5, 3  ;;  %v4763_v15 = vld [vmem:[%s5839_s3 + $0x60] sm:$0xff]   ;;  %v4764_v16 = vld [vmem:[%s5839_s3 + $0x70] sm:$0xff]   ;;  %v4765_v17 = vld [vmem:[%s5839_s3 + $0x68] sm:$0xff]  }
  0x29   : > { %4357 = vmatpush3.bf16.msra.mxu0 %v4753_v3  ;;  %4365 = vmatpush3.bf16.msra.mxu1 %v4754_v4  ;;  %s865_s11 = scalar_lea.vmem %s5840_s6, %s5120_s29  ;;  %v4766_v18 = vld [vmem:[%s5839_s3 + $0x78] sm:$0xff]   ;;  %v4767_v19 = vld [vmem:[%s5839_s3 + $0x80] sm:$0xff]   ;;  %v4768_v20 = vld [vmem:[%s5839_s3 + $0x90] sm:$0xff]   ;;  %s5842_s6 = smov %s5841_s7 }
  0x2a   : > { %4370 = vmatprep.subr.bf16.mxu0 %v4907_v1  ;;  %v5133_v7 = vld [vmem:[%s865_s11] sm:$0xff]  ;;  %4378 = vmatprep.subr.bf16.mxu1 %v4907_v1  ;;  %v4769_v21 = vld [vmem:[%s5839_s3 + $0x88] sm:$0xff]   ;;  %v4770_v22 = vld [vmem:[%s5839_s3 + $0x98] sm:$0xff]   ;;  %s877_s8 = scalar_lea.vmem %s5843_s2, %s5120_s29  ;;  %s5844_s2 = sld [smem:[#allocation18_spill]] }
  0x2b   : > { %v5138_v8 = vpack.c.bf16 %v5133_v7, %v5133_v7  ;;  %v4771_v23 = vld [vmem:[%s5839_s3 + $0xa0] sm:$0xff]   ;;  %v4772_v24 = vld [vmem:[%s5839_s3 + $0xb0] sm:$0xff]   ;;  %v4773_v25 = vld [vmem:[%s5839_s3 + $0xa8] sm:$0xff]   ;;  %s5848_s11 = sld [smem:[#allocation21_spill]] }
  0x2c   : > { %v4774_v26 = vld [vmem:[%s5839_s3 + $0xb8] sm:$0xff]   ;;  %v4088_v43 = vld [vmem:[%s5841_s7 + $0x4] ss:$0 sm:$0xff]  ;;  %v4089_v44 = vld [vmem:[%s5842_s6 + $0x5] ss:$0 sm:$0xff]  ;;  %s5849_s7 = sld [smem:[#allocation12_spill]] }
  0x2d   : > { %4359 = vmatmul.mubr.msk.bf16.vlgmr.msra.gmra.mrb[0].mxu0 %vm1037_vm1, %v5138_v8  ;;  %4367 = vmatmul.mubr.msk.bf16.vlgmr.msra.gmra.mrb[0].mxu1 %vm1037_vm1, %v5138_v8  ;;  %v4084_v57 = vld [vmem:[%s5842_s6] ss:$0 sm:$0xff]  ;;  %v4085_v58 = vld [vmem:[%s5842_s6 + $0x1] ss:$0 sm:$0xff]  ;;  %v4090_v61 = vld [vmem:[%s5842_s6 + $0x6] ss:$0 sm:$0xff] }
  0x2e   : > { %4371 = vmatpush3.bf16.msra.mxu0 %v4755_v5  ;;  %4379 = vmatpush3.bf16.msra.mxu1 %v4756_v6  ;;  %v4091_v62 = vld [vmem:[%s5842_s6 + $0x7] ss:$0 sm:$0xff] }
  0x2f   : > { %4372 = vmatprep.subr.bf16.mxu0 %v4907_v1  ;;  %4380 = vmatprep.subr.bf16.mxu1 %v4907_v1 }
  0x30   : > { %4374 = vmatprep.mubr.msk.bf16.mxu0 %vm4908_vm0, %v4907_v1  ;;  %4382 = vmatprep.mubr.msk.bf16.mxu1 %vm4908_vm0, %v4907_v1 }
  0x32   : > { %4373 = vmatpush3.bf16.msra.mxu0 %v4757_v9  ;;  %4381 = vmatpush3.bf16.msra.mxu1 %v4758_v10  ;;  %s869_s5 = scalar_lea.vmem %s5849_s7, %s5120_s29 }
  0x33   : > { %4386 = vmatprep.subr.bf16.mxu0 %v4907_v1  ;;  %4394 = vmatprep.subr.bf16.mxu1 %v4907_v1 }
  0x35   : > { %4375 = vmatmul.mubr.msk.bf16.vlgmr.msra.gmra.mrb[4].mxu0 %vm1037_vm1, %v5138_v8  ;;  %4383 = vmatmul.mubr.msk.bf16.vlgmr.msra.gmra.mrb[4].mxu1 %vm1037_vm1, %v5138_v8 }
  0x36   : > { %4387 = vmatpush3.bf16.msra.mxu0 %v4759_v11  ;;  %4395 = vmatpush3.bf16.msra.mxu1 %v4760_v12 }
  0x37   : > { %4388 = vmatprep.subr.bf16.mxu0 %v4907_v1  ;;  %4396 = vmatprep.subr.bf16.mxu1 %v4907_v1 }
  0x38   : > { %4390 = vmatprep.mubr.msk.bf16.mxu0 %vm4908_vm0, %v4907_v1  ;;  %4398 = vmatprep.mubr.msk.bf16.mxu1 %vm4908_vm0, %v4907_v1 }
  0x3a   : > { %4389 = vmatpush3.bf16.msra.mxu0 %v4761_v13  ;;  %4397 = vmatpush3.bf16.msra.mxu1 %v4762_v14 }
  0x3b   : > { %4402 = vmatprep.subr.bf16.mxu0 %v4907_v1  ;;  %4410 = vmatprep.subr.bf16.mxu1 %v4907_v1 }
  0x3d   : > { %4391 = vmatmul.mubr.msk.bf16.vlgmr.msra.gmra.mrb[8].mxu0 %vm1037_vm1, %v5138_v8  ;;  %4399 = vmatmul.mubr.msk.bf16.vlgmr.msra.gmra.mrb[8].mxu1 %vm1037_vm1, %v5138_v8 }
  0x3e   : > { %4403 = vmatpush3.bf16.msra.mxu0 %v4763_v15  ;;  %4411 = vmatpush3.bf16.msra.mxu1 %v4764_v16 }
  0x3f   : > { %4404 = vmatprep.subr.bf16.mxu0 %v4907_v1  ;;  %4412 = vmatprep.subr.bf16.mxu1 %v4907_v1 }
  0x40   : > { %4406 = vmatprep.mubr.msk.bf16.mxu0 %vm4908_vm0, %v4907_v1  ;;  %4414 = vmatprep.mubr.msk.bf16.mxu1 %vm4908_vm0, %v4907_v1 }
  0x42   : > { %4405 = vmatpush3.bf16.msra.mxu0 %v4765_v17  ;;  %4413 = vmatpush3.bf16.msra.mxu1 %v4766_v18  ;;  %v4086_v17 = vld [vmem:[%s5842_s6 + $0x2] ss:$0 sm:$0xff]  ;;  %v4087_v18 = vld [vmem:[%s5842_s6 + $0x3] ss:$0 sm:$0xff] }
  0x43   : > { %4418 = vmatprep.subr.bf16.mxu0 %v4907_v1  ;;  %4426 = vmatprep.subr.bf16.mxu1 %v4907_v1 }
  0x45   : > { %4407 = vmatmul.mubr.msk.bf16.vlgmr.msra.gmra.mrb[12].mxu0 %vm1037_vm1, %v5138_v8  ;;  %4415 = vmatmul.mubr.msk.bf16.vlgmr.msra.gmra.mrb[12].mxu1 %vm1037_vm1, %v5138_v8 }
  0x46   : > { %4419 = vmatpush3.bf16.msra.mxu0 %v4767_v19  ;;  %4422 = vmatprep.mubr.msk.bf16.mxu0 %vm4908_vm0, %v4907_v1 }
  0x47   : > { %4420 = vmatprep.subr.bf16.mxu0 %v4907_v1  ;;  %4430 = vmatprep.mubr.msk.bf16.mxu1 %vm4908_vm0, %v4907_v1 }
  0x48   : > { %4427 = vmatpush3.bf16.msra.mxu1 %v4768_v20 }
  0x49   : > { %4428 = vmatprep.subr.bf16.mxu1 %v4907_v1 }
  0x4a   : > { %4421 = vmatpush3.bf16.msra.mxu0 %v4769_v21 }
  0x4b   : > { %4434 = vmatprep.subr.bf16.mxu0 %v4907_v1 }
  0x4c   : > { %4429 = vmatpush3.bf16.msra.mxu1 %v4770_v22 }
  0x4d   : > { %4423 = vmatmul.mubr.msk.bf16.vlgmr.msra.gmra.mrb[16].mxu0 %vm1037_vm1, %v5138_v8  ;;  %4442 = vmatprep.subr.bf16.mxu1 %v4907_v1 }
  0x4e   : > { %4438 = vmatprep.mubr.msk.bf16.mxu0 %vm4908_vm0, %v4907_v1  ;;  %4435 = vmatpush3.bf16.msra.mxu0 %v4771_v23 }
  0x4f   : > { %4431 = vmatmul.mubr.msk.bf16.vlgmr.msra.gmra.mrb[16].mxu1 %vm1037_vm1, %v5138_v8  ;;  %4436 = vmatprep.subr.bf16.mxu0 %v4907_v1 }
  0x50   : > { %4443 = vmatpush3.bf16.msra.mxu1 %v4772_v24  ;;  %4446 = vmatprep.mubr.msk.bf16.mxu1 %vm4908_vm0, %v4907_v1 }
  0x51   : > { %4444 = vmatprep.subr.bf16.mxu1 %v4907_v1 }
  0x52   : > { %4437 = vmatpush3.bf16.msra.mxu0 %v4773_v25  ;;  %v4092_v25 = vld [vmem:[%s5842_s6 + $0x8] ss:$0 sm:$0xff] }
  0x53   : > { %4450 = vmatprep.subr.bf16.mxu0 %v4907_v1 }
  0x54   : > { %4445 = vmatpush3.bf16.msra.mxu1 %v4774_v26 }
  0x55   : > { %4456 = vmatprep.subr.bf16.mxu1 %v4907_v1  ;;  %4439 = vmatmul.mubr.msk.bf16.vlgmr.msra.gmra.mrb[20].mxu0 %vm1037_vm1, %v5138_v8 }
  0x56   : > { %4452 = vmatprep.mubr.msk.bf16.mxu0 %vm4908_vm0, %v4907_v1 }
  0x57   : > { %4447 = vmatmul.mubr.msk.bf16.vlgmr.msra.gmra.mrb[20].mxu1 %vm1037_vm1, %v5138_v8 }
  0x58   : > { %4458 = vmatprep.mubr.msk.bf16.mxu1 %vm4908_vm0, %v4907_v1 }
 0x100   : > { %v1075_v27 = vpop.f32.mrb[0].mxu0  ;;  %v1127_v28 = vpop.f32.mrb[0].mxu1 }
 0x101   : > { %v4360_v29 = vpop.f32.mrb[1].mxu0  ;;  %v4368_v30 = vpop.f32.mrb[1].mxu1  ;;  %v1076_v63 = vadd.f32 %v4084_v57, %v1075_v27  ;;  %v1128_v0 = vadd.f32 %v4085_v58, %v1127_v28  ;;  %v4093_v27 = vld [vmem:[%s5842_s6 + $0x9] ss:$0 sm:$0xff] }
 0x102   : > { %v1078_v31 = vpop.f32.mrb[2].mxu0  ;;  %v1130_v32 = vpop.f32.mrb[2].mxu1 }
 0x103   : > { %v4361_v33 = vpop.f32.mrb[3].mxu0  ;;  %v4369_v34 = vpop.f32.mrb[3].mxu1  ;;  %v1658_v11 = vpack.c.bf16 %v1076_v63, %v1076_v63  ;;  %v1659_v12 = vpack.c.bf16 %v1128_v0, %v1128_v0 }
 0x108   : > { %v1179_v35 = vpop.f32.mrb[4].mxu0  ;;  %v1231_v36 = vpop.f32.mrb[4].mxu1 }
 0x109   : > { %v4376_v37 = vpop.f32.mrb[5].mxu0  ;;  %v4384_v38 = vpop.f32.mrb[5].mxu1  ;;  %v1180_v21 = vadd.f32 %v4086_v17, %v1179_v35  ;;  %v1232_v22 = vadd.f32 %v4087_v18, %v1231_v36 }
 0x10a   : > { %v1182_v39 = vpop.f32.mrb[6].mxu0  ;;  %v1234_v40 = vpop.f32.mrb[6].mxu1 }
 0x10b   : > { %v4377_v41 = vpop.f32.mrb[7].mxu0  ;;  %v4385_v42 = vpop.f32.mrb[7].mxu1  ;;  %v1660_v23 = vpack.c.bf16 %v1180_v21, %v1180_v21  ;;  %v1661_v24 = vpack.c.bf16 %v1232_v22, %v1232_v22 }
 0x110   : > { %v1283_v45 = vpop.f32.mrb[8].mxu0  ;;  %v1335_v46 = vpop.f32.mrb[8].mxu1 }
 0x111   : > { %v1284_v47 = vadd.f32 %v4088_v43, %v1283_v45  ;;  %v1336_v48 = vadd.f32 %v4089_v44, %v1335_v46  ;;  %v4392_v49 = vpop.f32.mrb[9].mxu0  ;;  %v4400_v50 = vpop.f32.mrb[9].mxu1 }
 0x112   : > { %v1286_v51 = vpop.f32.mrb[10].mxu0  ;;  %v1338_v52 = vpop.f32.mrb[10].mxu1  ;;  %v886_v49 = vld [vmem:[%s877_s8] sm:$0xff]  ;;  %s859_s8 = sand.u32 1, %s4897_s4  }
 0x113   : > { %v1662_v53 = vpack.c.bf16 %v1284_v47, %v1284_v47  ;;  %v1663_v54 = vpack.c.bf16 %v1336_v48, %v1336_v48  ;;  %v4393_v55 = vpop.f32.mrb[11].mxu0  ;;  %v4401_v56 = vpop.f32.mrb[11].mxu1  ;;  %vm887_vm4 = vcmp.eq.f32.partialorder %v886_v49, 0.0  ;;  %s3954_s7 = scalar_lea.sflag [#allocation3], %s859_s8 }
 0x114   : > { %v888_v52 = vsel %vm887_vm4, -1e+30, %v4907_v1 }
 0x115   : > { %v1671_v59 = vsel %vm1666_vm2, %v1662_v53, 0  ;;  %v1717_v60 = vsel %vm1666_vm2, %v1663_v54, 0 }
 0x116   : > { %4451 = vmatpush3.bf16.xpose.msra.mxu0 %v1671_v59  ;;  %4457 = vmatpush3.bf16.xpose.msra.mxu1 %v1717_v60 }
 0x117   : > { %4462 = vmatprep.subr.bf16.mxu0 %v4907_v1  ;;  %4468 = vmatprep.subr.bf16.mxu1 %v4907_v1 }
 0x118   : > { %v1387_v2 = vpop.f32.mrb[12].mxu0  ;;  %v1439_v3 = vpop.f32.mrb[12].mxu1 }
 0x119   : > { %v1388_v4 = vadd.f32 %v4090_v61, %v1387_v2  ;;  %v1440_v5 = vadd.f32 %v4091_v62, %v1439_v3  ;;  %v4408_v6 = vpop.f32.mrb[13].mxu0  ;;  %v4416_v8 = vpop.f32.mrb[13].mxu1 }
 0x11a   : > { %v1390_v9 = vpop.f32.mrb[14].mxu0  ;;  %v1442_v10 = vpop.f32.mrb[14].mxu1 }
 0x11b   : > { %v1664_v13 = vpack.c.bf16 %v1388_v4, %v1388_v4  ;;  %v1665_v14 = vpack.c.bf16 %v1440_v5, %v1440_v5  ;;  %v4409_v15 = vpop.f32.mrb[15].mxu0  ;;  %v4417_v16 = vpop.f32.mrb[15].mxu1 }
 0x11d   : > { %v1763_v19 = vsel %vm1666_vm2, %v1664_v13, 0  ;;  %v1809_v20 = vsel %vm1666_vm2, %v1665_v14, 0  ;;  %4453 = vmatmul.mubr.msk.bf16.vlgmr.msra.gmra.mrb[24].mxu0 %vm1666_vm2, %v1658_v11  ;;  %4459 = vmatmul.mubr.msk.bf16.vlgmr.msra.gmra.mrb[24].mxu1 %vm1666_vm2, %v1659_v12 }
 0x11e   : > { %4463 = vmatpush3.bf16.xpose.msra.mxu0 %v1763_v19  ;;  %4469 = vmatpush3.bf16.xpose.msra.mxu1 %v1809_v20 }
 0x11f   : > { %4464 = vmatprep.mubr.msk.bf16.mxu0 %vm4908_vm0, %v4907_v1  ;;  %4470 = vmatprep.mubr.msk.bf16.mxu1 %vm4908_vm0, %v4907_v1 }
 0x120   : > { %4474 = vmatprep.subr.bf16.mxu0 %v4907_v1  ;;  %4480 = vmatprep.subr.bf16.mxu1 %v4907_v1  ;;  %v1491_v26 = vpop.f32.mrb[16].mxu0 }
 0x121   : > { %v1492_v28 = vadd.f32 %v4092_v25, %v1491_v26  ;;  %v4424_v29 = vpop.f32.mrb[17].mxu0 }
 0x122   : > { %v1494_v30 = vpop.f32.mrb[18].mxu0  ;;  %v1543_v31 = vpop.f32.mrb[16].mxu1 }
 0x123   : > { %v1907_v32 = vpack.c.bf16 %v1492_v28, %v1492_v28  ;;  %v4425_v33 = vpop.f32.mrb[19].mxu0  ;;  %v1544_v34 = vadd.f32 %v4093_v27, %v1543_v31  ;;  %v4432_v35 = vpop.f32.mrb[17].mxu1 }
 0x124   : > { %v1546_v36 = vpop.f32.mrb[18].mxu1 }
 0x125   : > { %4465 = vmatmul.mubr.msk.bf16.vlgmr.msra.gmra.mrb[28].mxu0 %vm1666_vm2, %v1660_v23  ;;  %4471 = vmatmul.mubr.msk.bf16.vlgmr.msra.gmra.mrb[28].mxu1 %vm1666_vm2, %v1661_v24  ;;  %v1916_v37 = vsel %vm1914_vm3, %v1907_v32, 0  ;;  %v1908_v38 = vpack.c.bf16 %v1544_v34, %v1544_v34  ;;  %v4433_v39 = vpop.f32.mrb[19].mxu1 }
 0x126   : > { %4476 = vmatprep.mubr.msk.bf16.mxu0 %vm4908_vm0, %v4907_v1  ;;  %4482 = vmatprep.mubr.msk.bf16.mxu1 %vm4908_vm0, %v4907_v1  ;;  %v4094_v39 = vld [vmem:[%s5842_s6 + $0xa] ss:$0 sm:$0xff] }
 0x127   : > { %4475 = vmatpush3.bf16.msra.mxu0 %v1916_v37  ;;  %v1962_v40 = vsel %vm1914_vm3, %v1908_v38, 0 }
 0x128   : > { %4486 = vmatprep.subr.bf16.mxu0 %v4907_v1  ;;  %4481 = vmatpush3.bf16.msra.mxu1 %v1962_v40  ;;  %v5316_v41 = vpop.f32.mrb[20].mxu0 }
 0x129   : > { %4492 = vmatprep.subr.bf16.mxu1 %v4907_v1  ;;  %v4440_v43 = vpop.f32.mrb[21].mxu0  ;;  %v1596_v40 = vadd.f32 %v4094_v39, %v5316_v41 }
 0x12a   : > { %v5318_v42 = vpop.f32.mrb[20].mxu1  ;;  %v1598_v45 = vpop.f32.mrb[22].mxu0 }
 0x12b   : > { %v4448_v44 = vpop.f32.mrb[21].mxu1  ;;  %v4441_v47 = vpop.f32.mrb[23].mxu0 }
 0x12c   : > { %v1650_v46 = vpop.f32.mrb[22].mxu1  ;;  %v4095_v44 = vld [vmem:[%s5842_s6 + $0xb] ss:$0 sm:$0xff]  ;;  %s873_s6 = scalar_lea.vmem %s5850_s30, %s5120_s29  ;;  %s4223_s30 = sshll.u32 %s5071_s9, 7 }
 0x12d   : > { %v4449_v48 = vpop.f32.mrb[23].mxu1  ;;  %v1909_v46 = vpack.c.bf16 %v1596_v40, %v1596_v40  ;;  %v1648_v47 = vadd.f32 %v4095_v44, %v5318_v42  ;;  %v1653_v42 = vld [vmem:[%s5844_s2] sm:$0xf]  ;;  %s4909_s9 = smov [#allocation2]  }
 0x1f0   : > { %v1707_v50 = vpop.f32.mrb[24].mxu0  ;;  %v1753_v51 = vpop.f32.mrb[24].mxu1 }
 0x1f1   : > { %v1851_v53 = vmul.f32 0.35355338, %v1707_v50  ;;  %v1852_v54 = vmul.f32 0.35355338, %v1753_v51  ;;  %v4454_v55 = vpop.f32.mrb[25].mxu0  ;;  %v4460_v56 = vpop.f32.mrb[25].mxu1 }
 0x1f2   : > { %v1710_v57 = vpop.f32.mrb[26].mxu0  ;;  %v1756_v58 = vpop.f32.mrb[26].mxu1 }
 0x1f3   : > { %v4455_v59 = vpop.f32.mrb[27].mxu0  ;;  %v4461_v60 = vpop.f32.mrb[27].mxu1  ;;  %v1855_v61 = vadd.f32 %v1851_v53, %v888_v52  ;;  %v1856_v62 = vadd.f32 %v1852_v54, %v888_v52  ;;  %v1910_v53 = vpack.c.bf16 %v1648_v47, %v1648_v47  ;;  %v4144_v47 = vld [vmem:[%s5845_s28] ss:$0 sm:$0xff]  ;;  %s4078_s28 = sshll.u32 %s859_s8, 3 }
 0x1f4   : > { %v2104_v59 = vsel %vm1914_vm3, %v1653_v42, 0 }
 0x1f5   : > { %v1859_v63 = vsel %vm1666_vm2, %v1855_v61, -inf  ;;  %v1862_v3 = vsel %vm1666_vm2, %v1856_v62, -inf  ;;  %v2054_v56 = vsel %vm1914_vm3, %v1910_v53, 0 }
 0x1f6   : > { %1860 = vmax.xlane.f32.xlu0 %v1859_v63  ;;  %v1654_v63 = vld [vmem:[%s5844_s2 + $0x4] sm:$0xf] }
 0x1f8   : > { %v1799_v0 = vpop.f32.mrb[28].mxu0  ;;  %v1845_v2 = vpop.f32.mrb[28].mxu1 }
 0x1f9   : > { %v1853_v4 = vmul.f32 0.35355338, %v1799_v0  ;;  %v1854_v5 = vmul.f32 0.35355338, %v1845_v2  ;;  %v4466_v6 = vpop.f32.mrb[29].mxu0  ;;  %v4472_v8 = vpop.f32.mrb[29].mxu1 }
 0x1fa   : > { %v1848_v9 = vpop.f32.mrb[30].mxu1  ;;  %1863 = vmax.xlane.f32.xlu0 %v1862_v3  ;;  %v1802_v10 = vpop.f32.mrb[30].mxu0  ;;  %v2150_v0 = vsel %vm1914_vm3, %v1654_v63, 0  ;;  %v1655_v2 = vld [vmem:[%s5844_s2 + $0x8] sm:$0xf] }
 0x1fb   : > { %v4467_v11 = vpop.f32.mrb[31].mxu0  ;;  %v4473_v12 = vpop.f32.mrb[31].mxu1  ;;  %v1857_v13 = vadd.f32 %v1853_v4, %v888_v52  ;;  %v1858_v15 = vadd.f32 %v1854_v5, %v888_v52  ;;  %v2008_v52 = vsel %vm1914_vm3, %v1909_v46, 0  ;;  %v2196_v6 = vsel %vm1914_vm3, %v1655_v2, 0  ;;  %v1656_v9 = vld [vmem:[%s5844_s2 + $0xc] sm:$0xf] }
 0x1fc   : > { %s5851_s2 = sld [smem:[#allocation15_spill]] }
 0x1fd   : > { %v1865_v14 = vsel %vm1666_vm2, %v1857_v13, -inf  ;;  %v1868_v16 = vsel %vm1666_vm2, %v1858_v15, -inf }
 0x1fe   : > { %1866 = vmax.xlane.f32.xlu1 %v1865_v14  ;;  %v2242_v14 = vsel %vm1914_vm3, %v1656_v9, 0  ;;  %v4779_v9 = vld [vmem:[%s5846_s0 + $0x20] sm:$0xff]  }
 0x202   : > { %1869 = vmax.xlane.f32.xlu1 %v1868_v16 }
 0x283   : > { %v1861_v17 = vpop.xlane.xlu0 %1860 }
 0x284   : > { %v1871_v18 = vsub.f32 %v1855_v61, %v1861_v17 }
 0x286   : > { %v1875_v19 = vmul.f32 1.442695, %v1871_v18 }
 0x287   : > { %v1864_v20 = vpop.xlane.xlu0 %1863 }
 0x288   : > { %4805 = vpow2.f32 %v1875_v19  ;;  %v1872_v21 = vsub.f32 %v1856_v62, %v1864_v20 }
 0x28a   : > { %v1877_v22 = vmul.f32 1.442695, %v1872_v21 }
 0x28b   : > { %v1867_v23 = vpop.xlane.xlu1 %1866 }
 0x28c   : > { %4807 = vpow2.f32 %v1877_v22  ;;  %v1873_v24 = vsub.f32 %v1857_v13, %v1867_v23 }
 0x28e   : > { %v1879_v25 = vmul.f32 1.442695, %v1873_v24 }
 0x28f   : > { %v1870_v26 = vpop.xlane.xlu1 %1869 }
 0x290   : > { %4809 = vpow2.f32 %v1879_v25  ;;  %v1874_v27 = vsub.f32 %v1858_v15, %v1870_v26 }
 0x292   : > { %v4806_v28 = vpop.eup %4805  ;;  %v1881_v29 = vmul.f32 1.442695, %v1874_v27 }
 0x293   : > { %v1883_v30 = vsel %vm1666_vm2, %v4806_v28, 0.0 }
 0x294   : > { %4811 = vpow2.f32 %v1881_v29  ;;  %1884 = vadd.xlane.f32.xlu0 %v1883_v30 }
 0x296   : > { %v4808_v31 = vpop.eup %4807 }
 0x297   : > { %v1886_v32 = vsel %vm1666_vm2, %v4808_v31, 0.0 }
 0x298   : > { %1887 = vadd.xlane.f32.xlu1 %v1886_v32 }
 0x29a   : > { %v4810_v33 = vpop.eup %4809 }
 0x29b   : > { %v1889_v34 = vsel %vm1666_vm2, %v4810_v33, 0.0 }
 0x29c   : > { %1890 = vadd.xlane.f32.xlu0 %v1889_v34 }
 0x29e   : > { %v4812_v35 = vpop.eup %4811 }
 0x29f   : > { %v1892_v36 = vsel %vm1666_vm2, %v4812_v35, 0.0 }
 0x2a0   : > { %1893 = vadd.xlane.f32.xlu1 %v1892_v36 }
 0x321   : > { %v1885_v37 = vpop.xlane.xlu0 %1884 }
 0x322   : > { %4813 = vrcp.f32 %v1885_v37 }
 0x325   : > { %v1888_v38 = vpop.xlane.xlu1 %1887 }
 0x326   : > { %4815 = vrcp.f32 %v1888_v38 }
 0x329   : > { %v1891_v43 = vpop.xlane.xlu0 %1890 }
 0x32a   : > { %4817 = vrcp.f32 %v1891_v43 }
 0x32c   : > { %v4814_v45 = vpop.eup %4813 }
 0x32d   : > { %v1899_v48 = vmul.f32 %v4814_v45, %v4806_v28  ;;  %v1894_v49 = vpop.xlane.xlu1 %1893 }
 0x32e   : > { %4819 = vrcp.f32 %v1894_v49 }
 0x32f   : > { %v1903_v50 = vpack.c.bf16 %v1899_v48, %v1899_v48 }
 0x330   : > { %v4816_v51 = vpop.eup %4815 }
 0x331   : > { %v1900_v54 = vmul.f32 %v4816_v51, %v4808_v31  ;;  %4477 = vmatmul.mubr.msk.bf16.vlgmr.msra.gmra.mrb[32].mxu0 %vm1666_vm2, %v1903_v50 }
 0x332   : > { %4487 = vmatpush3.bf16.msra.mxu0 %v2008_v52  ;;  %4488 = vmatprep.mubr.msk.bf16.mxu0 %vm4908_vm0, %v4907_v1 }
 0x333   : > { %v1904_v41 = vpack.c.bf16 %v1900_v54, %v1900_v54  ;;  %4498 = vmatprep.subr.bf16.mxu0 %v4907_v1 }
 0x334   : > { %v4818_v55 = vpop.eup %4817 }
 0x335   : > { %v1901_v57 = vmul.f32 %v4818_v55, %v4810_v33  ;;  %4483 = vmatmul.mubr.msk.bf16.vlgmr.msra.gmra.mrb[32].mxu1 %vm1666_vm2, %v1904_v41 }
 0x336   : > { %4493 = vmatpush3.bf16.msra.mxu1 %v2054_v56  ;;  %4494 = vmatprep.mubr.msk.bf16.mxu1 %vm4908_vm0, %v4907_v1 }
 0x337   : > { %v1905_v58 = vpack.c.bf16 %v1901_v57, %v1901_v57  ;;  %4504 = vmatprep.subr.bf16.mxu1 %v4907_v1 }
 0x338   : > { %v4820_v60 = vpop.eup %4819 }
 0x339   : > { %v1902_v61 = vmul.f32 %v4820_v60, %v4812_v35  ;;  %4489 = vmatmul.mubr.msk.bf16.vlgmr.msra.gmra.mrb[36].mxu0 %vm1666_vm2, %v1905_v58  ;;  %v4776_v60 = vld [vmem:[%s5846_s0 + $0x10] sm:$0xff]  }
 0x33a   : > { %4499 = vmatpush3.bf16.msra.mxu0 %v2104_v59  ;;  %4500 = vmatprep.mubr.msk.bf16.mxu0 %vm4908_vm0, %v4907_v1  ;;  %v4775_v59 = vld [vmem:[%s5846_s0] sm:$0xff]  }
 0x33b   : > { %v1906_v62 = vpack.c.bf16 %v1902_v61, %v1902_v61  ;;  %4510 = vmatprep.subr.bf16.mxu0 %v4907_v1  ;;  %v4778_v61 = vld [vmem:[%s5846_s0 + $0x18] sm:$0xff]  }
 0x33d   : > { %4495 = vmatmul.mubr.msk.bf16.vlgmr.msra.gmra.mrb[36].mxu1 %vm1666_vm2, %v1906_v62 }
 0x33e   : > { %4506 = vmatprep.mubr.msk.bf16.mxu1 %vm4908_vm0, %v4907_v1  ;;  %4505 = vmatpush3.bf16.msra.mxu1 %v2150_v0 }
 0x33f   : > { %4516 = vmatprep.subr.bf16.mxu1 %v4907_v1 }
 0x404   : > { %v1952_v3 = vpop.f32.mrb[32].mxu0 }
 0x405   : > { %v2096_v4 = vpack.c.bf16 %v1952_v3, %v1952_v3  ;;  %v4478_v5 = vpop.f32.mrb[33].mxu0  ;;  %v4145_v3 = vld [vmem:[%s5847_s10] ss:$0 sm:$0xff] }
 0x406   : > { %v1955_v8 = vpop.f32.mrb[34].mxu0  ;;  %v4146_v5 = vld [vmem:[%s5848_s11] ss:$0 sm:$0xff]  ;;  %s881_s11 = scalar_lea.vmem %s5851_s2, %s5120_s29 }
 0x407   : > { %v4479_v10 = vpop.f32.mrb[35].mxu0  ;;  %4501 = vmatmul.mubr.msk.bf16.vlgmr.msra.gmra.mrb[40].mxu0 %vm1666_vm2, %v2096_v4 }
 0x408   : > { %v1998_v11 = vpop.f32.mrb[32].mxu1  ;;  %4511 = vmatpush3.bf16.msra.mxu0 %v2196_v6  ;;  %4512 = vmatprep.mubr.msk.bf16.mxu0 %vm4908_vm0, %v4907_v1  ;;  %v4780_v10 = vld [vmem:[%s5846_s0 + $0x30] sm:$0xff]  }
 0x409   : > { %v2097_v12 = vpack.c.bf16 %v1998_v11, %v1998_v11  ;;  %v4484_v13 = vpop.f32.mrb[33].mxu1  ;;  %4522 = vmatprep.subr.bf16.mxu0 %v4907_v1 }
 0x40a   : > { %v2001_v15 = vpop.f32.mrb[34].mxu1  ;;  %v4782_v13 = vld [vmem:[%s5846_s0 + $0x38] sm:$0xff]  }
 0x40b   : > { %v4485_v16 = vpop.f32.mrb[35].mxu1  ;;  %4507 = vmatmul.mubr.msk.bf16.vlgmr.msra.gmra.mrb[40].mxu1 %vm1666_vm2, %v2097_v12  ;;  %v4781_v12 = vld [vmem:[%s5846_s0 + $0x28] sm:$0xff]   ;;  %v4784_v15 = vld [vmem:[%s5790_s13 + $0x10] sm:$0xff]  }
 0x40c   : > { %v2044_v17 = vpop.f32.mrb[36].mxu0  ;;  %4517 = vmatpush3.bf16.msra.mxu1 %v2242_v14  ;;  %4518 = vmatprep.mubr.msk.bf16.mxu1 %vm4908_vm0, %v4907_v1  ;;  %v4783_v14 = vld [vmem:[%s5790_s13] sm:$0xff]   ;;  %v4785_v16 = vld [vmem:[%s5790_s13 + $0x8] sm:$0xff]  }
 0x40d   : > { %v2098_v18 = vpack.c.bf16 %v2044_v17, %v2044_v17  ;;  %v4490_v19 = vpop.f32.mrb[37].mxu0  ;;  %4530 = vmatprep.subr.bf16.mxu1 %v4907_v1  ;;  %v4786_v17 = vld [vmem:[%s5790_s13 + $0x18] sm:$0xff]  }
 0x40e   : > { %v2047_v20 = vpop.f32.mrb[38].mxu0 }
 0x40f   : > { %v4491_v21 = vpop.f32.mrb[39].mxu0  ;;  %4513 = vmatmul.mubr.msk.bf16.vlgmr.msra.gmra.mrb[44].mxu0 %vm1666_vm2, %v2098_v18  ;;  %v884_v18 = vld [vmem:[%s869_s5] sm:$0xff] }
 0x410   : > { %v2090_v22 = vpop.f32.mrb[36].mxu1  ;;  %4526 = vmatprep.mubr.msk.bf16.mxu0 %vm4908_vm0, %v4907_v1  ;;  %4523 = vmatpush3.bf16.msra.mxu0 %v4775_v59  ;;  %v2585_v19 = vpack.c.bf16 %v884_v18, %v884_v18  ;;  %v4787_v20 = vld [vmem:[%s5790_s13 + $0x20] sm:$0xff]   ;;  %v4788_v21 = vld [vmem:[%s5790_s13 + $0x30] sm:$0xff]  }
 0x411   : > { %v2099_v23 = vpack.c.bf16 %v2090_v22, %v2090_v22  ;;  %v4496_v24 = vpop.f32.mrb[37].mxu1  ;;  %4524 = vmatprep.subr.bf16.mxu0 %v4907_v1  ;;  %v4789_v22 = vld [vmem:[%s5790_s13 + $0x28] sm:$0xff]  }
 0x412   : > { %v2093_v25 = vpop.f32.mrb[38].mxu1  ;;  %v4791_v24 = vld [vmem:[%s5792_s15] sm:$0xff]  }
 0x413   : > { %v4497_v26 = vpop.f32.mrb[39].mxu1  ;;  %4519 = vmatmul.mubr.msk.bf16.vlgmr.msra.gmra.mrb[44].mxu1 %vm1666_vm2, %v2099_v23  ;;  %v4790_v23 = vld [vmem:[%s5790_s13 + $0x38] sm:$0xff]   ;;  %v4792_v25 = vld [vmem:[%s5792_s15 + $0x10] sm:$0xff]  }
 0x414   : > { %4534 = vmatprep.mubr.msk.bf16.mxu1 %vm4908_vm0, %v4907_v1  ;;  %4531 = vmatpush3.bf16.msra.mxu1 %v4776_v60  ;;  %v4793_v26 = vld [vmem:[%s5792_s15 + $0x8] sm:$0xff]  }
 0x415   : > { %4532 = vmatprep.subr.bf16.mxu1 %v4907_v1 }
 0x418   : > { %4533 = vmatpush3.bf16.msra.mxu1 %v4778_v61 }
 0x419   : > { %4546 = vmatprep.subr.bf16.mxu1 %v4907_v1 }
 0x4da   : > { %v2140_v27 = vpop.f32.mrb[40].mxu0 }
 0x4db   : > { %v4502_v28 = vpop.f32.mrb[41].mxu0  ;;  %v2284_v32 = vsel %vm1037_vm1, %v2140_v27, 0.0  ;;  %v4794_v27 = vld [vmem:[%s5792_s15 + $0x18] sm:$0xff]  }
 0x4dc   : > { %v2143_v29 = vpop.f32.mrb[42].mxu0  ;;  %v885_v28 = vld [vmem:[%s873_s6] sm:$0xff]  ;;  %s861_s6 = scalar_lea.vmem [#allocation2], %s4078_s28  ;;  %s4847_s28 = sshll.u32 %s4909_s9, 4  ;;  %s4848_s28 = int_to_ptr.vmem [resolvable:$false] %s4847_s28 }
 0x4dd   : > { %v4503_v30 = vpop.f32.mrb[43].mxu0  ;;  %v2841_v29 = vpack.c.bf16 %v885_v28, %v885_v28  ;;  %s3967_s2 = sshll.u32 %s861_s6, 4  ;;  %s4849_s10 = scalar_lea.vmem %s4848_s28, 256  ;;  %s5736_s2 = int_to_ptr.vmem [resolvable:$true] %s3967_s2 }
 0x4de   : > { %v2186_v31 = vpop.f32.mrb[40].mxu1  ;;  %v4795_v30 = vld [vmem:[%s5792_s15 + $0x20] sm:$0xff]   ;;  %s4843_s5 = scalar_lea.vmem %s5736_s2, 128  ;;  %p4850_p0 = scmp.lt.s32.totalorder %s5736_s2, %s4848_s28 }
 0x4df   : > { %v2285_v33 = vsel %vm1037_vm1, %v2186_v31, 0.0  ;;  %v4508_v34 = vpop.f32.mrb[41].mxu1  ;;  %v4796_v31 = vld [vmem:[%s5792_s15 + $0x30] sm:$0xff]   ;;  %p4844_p11 = scmp.ne.s32.totalorder %s5736_s2, %s4843_s5  ;;  %p4851_p1 = scmp.lt.s32.totalorder %s4849_s10, %s4843_s5 }
 0x4e0   : > { %v2286_v35 = vadd.f32 %v2285_v33, %v2284_v32  ;;  %v2189_v36 = vpop.f32.mrb[42].mxu1  ;;  %v4797_v32 = vld [vmem:[%s5792_s15 + $0x28] sm:$0xff]   ;;  %v4798_v33 = vld [vmem:[%s5792_s15 + $0x38] sm:$0xff]  }
 0x4e1   : > { %v4509_v37 = vpop.f32.mrb[43].mxu1  ;;  %p4845_p12 = pnand %p4844_p11, %p5088_p5  ;;  %p4852_p2 = por %p4851_p1, %p4850_p0 }
 0x4e2   : > { %v2232_v38 = vpop.f32.mrb[44].mxu0 }
 0x4e3   : > { %v2287_v39 = vsel %vm1037_vm1, %v2232_v38, 0.0  ;;  %v4514_v40 = vpop.f32.mrb[45].mxu0  ;;  %p4846_p13 = pneg %p4845_p12 }
 0x4e4   : > { %v2288_v43 = vadd.f32 %v2287_v39, %v2286_v35  ;;  %v2235_v44 = vpop.f32.mrb[46].mxu0 }
 0x4e5   : > { %v4515_v45 = vpop.f32.mrb[47].mxu0  ;;  %p4853_p3 = pnand %p4852_p2, %p4846_p13 }
 0x4e6   : > { %v2278_v46 = vpop.f32.mrb[44].mxu1 }
 0x4e7   : > { %v2289_v48 = vsel %vm1037_vm1, %v2278_v46, 0.0  ;;  %v4520_v49 = vpop.f32.mrb[45].mxu1 }
 0x4e8   : > { %v2290_v50 = vadd.f32 %v2289_v48, %v2288_v43  ;;  %v2281_v51 = vpop.f32.mrb[46].mxu1 }
 0x4e9   : > { %v4521_v52 = vpop.f32.mrb[47].mxu1 }
 0x4ea   : > { %v2297_v53 = vadd.f32 %v4144_v47, %v2290_v50  ;;  %v4163_v52 = vld [vmem:[%s5791_s14] ss:$0 sm:$0xff] }
 0x4ec   : > { %v2298_v54 = vadd.f32 %v2297_v53, %v5133_v7  ;;  %v4777_v7 = vld [vmem:[%s5846_s0 + $0x8] sm:$0xff]   ;;  %v4164_v53 = vld [vmem:[%s5791_s14 + $0x1] ss:$0 sm:$0xff]  ;;  %s5734_s0 = scalar_lea.hbm %s5804_s27, %s4223_s30 }
 0x4ed   : > { %4525 = vmatpush3.bf16.msra.mxu0 %v4777_v7 }
 0x4ee   : > { %v2301_v41 = vsel %vm1037_vm1, %v2298_v54, 0.0  ;;  %4538 = vmatprep.subr.bf16.mxu0 %v4907_v1 }
 0x4ef   : > { %2302 = vadd.xlane.f32.xlu0 %v2301_v41 }
 0x57c   : > { %v2303_v55 = vpop.xlane.xlu0 %2302 }
 0x57d   : > { %v2305_v42 = vmul.f32 0.03125, %v2303_v55 }
 0x57f   : > { %v2306_v56 = vsub.f32 %v2298_v54, %v2305_v42 }
 0x581   : > { %v2307_v57 = vmul.f32 %v2306_v56, %v2306_v56 }
 0x583   : > { %v2308_v58 = vsel %vm1037_vm1, %v2307_v57, 0.0 }
 0x584   : > { %2309 = vadd.xlane.f32.xlu1 %v2308_v58 }
 0x611   : > { %v2310_v62 = vpop.xlane.xlu1 %2309 }
 0x612   : > { %v2311_v63 = vmul.f32 0.03125, %v2310_v62 }
 0x614   : > { %v2312_v0 = vadd.f32 1e-06, %v2311_v63  ;;  %v4147_v63 = vld [vmem:[%s5789_s12] ss:$0 sm:$0xff] }
 0x616   : > { %4821 = vrsqrt.f32 %v2312_v0  ;;  %v4148_v0 = vld [vmem:[%s5789_s12 + $0x1] ss:$0 sm:$0xff] }
 0x620   : > { %v4822_v2 = vpop.eup %4821 }
 0x621   : > { %v2314_v4 = vmul.f32 %v4822_v2, %v2306_v56 }
 0x623   : > { %v2321_v6 = vmul.f32 %v4145_v3, %v2314_v4  ;;  %v4165_v4 = vld [vmem:[%s5791_s14 + $0x2] ss:$0 sm:$0xff] }
 0x625   : > { %v5421_v8 = vadd.f32 %v4146_v5, %v2321_v6  ;;  %v4166_v5 = vld [vmem:[%s5791_s14 + $0x3] ss:$0 sm:$0xff] }
 0x627   : > { %v2329_v11 = vpack.c.bf16 %v5421_v8, %v5421_v8 }
 0x629   : > { %4527 = vmatmul.mubr.msk.bf16.vlgmr.msra.gmra.mrb[48].mxu0 %vm1037_vm1, %v2329_v11  ;;  %4535 = vmatmul.mubr.msk.bf16.vlgmr.msra.gmra.mrb[48].mxu1 %vm1037_vm1, %v2329_v11 }
 0x62a   : > { %4539 = vmatpush3.bf16.msra.mxu0 %v4779_v9  ;;  %4547 = vmatpush3.bf16.msra.mxu1 %v4780_v10 }
 0x62b   : > { %4540 = vmatprep.subr.bf16.mxu0 %v4907_v1  ;;  %4548 = vmatprep.subr.bf16.mxu1 %v4907_v1 }
 0x62c   : > { %4542 = vmatprep.mubr.msk.bf16.mxu0 %vm4908_vm0, %v4907_v1  ;;  %4550 = vmatprep.mubr.msk.bf16.mxu1 %vm4908_vm0, %v4907_v1 }
 0x62e   : > { %4541 = vmatpush3.bf16.msra.mxu0 %v4781_v12  ;;  %4549 = vmatpush3.bf16.msra.mxu1 %v4782_v13 }
 0x62f   : > { %4554 = vmatprep.subr.bf16.mxu0 %v4907_v1  ;;  %4562 = vmatprep.subr.bf16.mxu1 %v4907_v1 }
 0x631   : > { %4543 = vmatmul.mubr.msk.bf16.vlgmr.msra.gmra.mrb[52].mxu0 %vm1037_vm1, %v2329_v11  ;;  %4551 = vmatmul.mubr.msk.bf16.vlgmr.msra.gmra.mrb[52].mxu1 %vm1037_vm1, %v2329_v11 }
 0x632   : > { %4555 = vmatpush3.bf16.msra.mxu0 %v4783_v14  ;;  %4563 = vmatpush3.bf16.msra.mxu1 %v4784_v15 }
 0x633   : > { %4556 = vmatprep.subr.bf16.mxu0 %v4907_v1  ;;  %4564 = vmatprep.subr.bf16.mxu1 %v4907_v1 }
 0x634   : > { %4558 = vmatprep.mubr.msk.bf16.mxu0 %vm4908_vm0, %v4907_v1  ;;  %4566 = vmatprep.mubr.msk.bf16.mxu1 %vm4908_vm0, %v4907_v1 }
 0x636   : > { %4557 = vmatpush3.bf16.msra.mxu0 %v4785_v16  ;;  %4565 = vmatpush3.bf16.msra.mxu1 %v4786_v17 }
 0x637   : > { %4570 = vmatprep.subr.bf16.mxu0 %v4907_v1  ;;  %4578 = vmatprep.subr.bf16.mxu1 %v4907_v1 }
 0x639   : > { %4559 = vmatmul.mubr.msk.bf16.vlgmr.msra.gmra.mrb[56].mxu0 %vm1037_vm1, %v2585_v19  ;;  %4567 = vmatmul.mubr.msk.bf16.vlgmr.msra.gmra.mrb[56].mxu1 %vm1037_vm1, %v2585_v19 }
 0x63a   : > { %4571 = vmatpush3.bf16.msra.mxu0 %v4787_v20  ;;  %4579 = vmatpush3.bf16.msra.mxu1 %v4788_v21 }
 0x63b   : > { %4572 = vmatprep.subr.bf16.mxu0 %v4907_v1  ;;  %4580 = vmatprep.subr.bf16.mxu1 %v4907_v1 }
 0x63c   : > { %4574 = vmatprep.mubr.msk.bf16.mxu0 %vm4908_vm0, %v4907_v1  ;;  %4582 = vmatprep.mubr.msk.bf16.mxu1 %vm4908_vm0, %v4907_v1 }
 0x63e   : > { %4573 = vmatpush3.bf16.msra.mxu0 %v4789_v22  ;;  %4581 = vmatpush3.bf16.msra.mxu1 %v4790_v23 }
 0x63f   : > { %4586 = vmatprep.subr.bf16.mxu0 %v4907_v1  ;;  %4594 = vmatprep.subr.bf16.mxu1 %v4907_v1 }
 0x641   : > { %4575 = vmatmul.mubr.msk.bf16.vlgmr.msra.gmra.mrb[60].mxu0 %vm1037_vm1, %v2585_v19  ;;  %4583 = vmatmul.mubr.msk.bf16.vlgmr.msra.gmra.mrb[60].mxu1 %vm1037_vm1, %v2585_v19 }
 0x642   : > { %4587 = vmatpush3.bf16.msra.mxu0 %v4791_v24  ;;  %4590 = vmatprep.mubr.msk.bf16.mxu0 %vm4908_vm0, %v4907_v1  ;;  %v4149_v24 = vld [vmem:[%s5789_s12 + $0x2] ss:$0 sm:$0xff] }
 0x643   : > { %4588 = vmatprep.subr.bf16.mxu0 %v4907_v1  ;;  %4598 = vmatprep.mubr.msk.bf16.mxu1 %vm4908_vm0, %v4907_v1 }
 0x644   : > { %4595 = vmatpush3.bf16.msra.mxu1 %v4792_v25  ;;  %v4150_v25 = vld [vmem:[%s5789_s12 + $0x3] ss:$0 sm:$0xff] }
 0x645   : > { %4596 = vmatprep.subr.bf16.mxu1 %v4907_v1 }
 0x646   : > { %4589 = vmatpush3.bf16.msra.mxu0 %v4793_v26 }
 0x647   : > { %4602 = vmatprep.subr.bf16.mxu0 %v4907_v1 }
 0x648   : > { %4597 = vmatpush3.bf16.msra.mxu1 %v4794_v27 }
 0x649   : > { %4591 = vmatmul.mubr.msk.bf16.vlgmr.msra.gmra.mrb[64].mxu0 %vm1037_vm1, %v2841_v29  ;;  %4610 = vmatprep.subr.bf16.mxu1 %v4907_v1 }
 0x64a   : > { %4606 = vmatprep.mubr.msk.bf16.mxu0 %vm4908_vm0, %v4907_v1  ;;  %4603 = vmatpush3.bf16.msra.mxu0 %v4795_v30 }
 0x64b   : > { %4599 = vmatmul.mubr.msk.bf16.vlgmr.msra.gmra.mrb[64].mxu1 %vm1037_vm1, %v2841_v29  ;;  %4604 = vmatprep.subr.bf16.mxu0 %v4907_v1 }
 0x64c   : > { %4611 = vmatpush3.bf16.msra.mxu1 %v4796_v31  ;;  %4614 = vmatprep.mubr.msk.bf16.mxu1 %vm4908_vm0, %v4907_v1 }
 0x64d   : > { %4612 = vmatprep.subr.bf16.mxu1 %v4907_v1 }
 0x64e   : > { %4605 = vmatpush3.bf16.msra.mxu0 %v4797_v32  ;;  %v4179_v32 = vld [vmem:[%s5793_s16] ss:$0 sm:$0xff] }
 0x64f   : > { %4618 = vmatprep.subr.bf16.mxu0 %v4907_v1 }
 0x650   : > { %4613 = vmatpush3.bf16.msra.mxu1 %v4798_v33 }
 0x651   : > { %4624 = vmatprep.subr.bf16.mxu1 %v4907_v1  ;;  %4607 = vmatmul.mubr.msk.bf16.vlgmr.msra.gmra.mrb[68].mxu0 %vm1037_vm1, %v2841_v29 }
 0x652   : > { %4620 = vmatprep.mubr.msk.bf16.mxu0 %vm4908_vm0, %v4907_v1 }
 0x653   : > { %4615 = vmatmul.mubr.msk.bf16.vlgmr.msra.gmra.mrb[68].mxu1 %vm1037_vm1, %v2841_v29 }
 0x654   : > { %4626 = vmatprep.mubr.msk.bf16.mxu1 %vm4908_vm0, %v4907_v1 }
 0x6fc   : > { %v2423_v34 = vpop.f32.mrb[48].mxu0  ;;  %v2475_v35 = vpop.f32.mrb[48].mxu1 }
 0x6fd   : > { %v4528_v36 = vpop.f32.mrb[49].mxu0  ;;  %v4536_v37 = vpop.f32.mrb[49].mxu1  ;;  %v2424_v6 = vadd.f32 %v4147_v63, %v2423_v34  ;;  %v2476_v9 = vadd.f32 %v4148_v0, %v2475_v35  ;;  %v4180_v34 = vld [vmem:[%s5793_s16 + $0x1] ss:$0 sm:$0xff] }
 0x6fe   : > { %v2426_v38 = vpop.f32.mrb[50].mxu0  ;;  %v2478_v39 = vpop.f32.mrb[50].mxu1 }
 0x6ff   : > { %v4529_v40 = vpop.f32.mrb[51].mxu0  ;;  %v4537_v43 = vpop.f32.mrb[51].mxu1  ;;  %v3102_v18 = vpack.c.bf16 %v2424_v6, %v2424_v6  ;;  %v3103_v19 = vpack.c.bf16 %v2476_v9, %v2476_v9 }
 0x704   : > { %v2527_v44 = vpop.f32.mrb[52].mxu0  ;;  %v2579_v45 = vpop.f32.mrb[52].mxu1 }
 0x705   : > { %v4544_v46 = vpop.f32.mrb[53].mxu0  ;;  %v4552_v47 = vpop.f32.mrb[53].mxu1  ;;  %v2528_v28 = vadd.f32 %v4149_v24, %v2527_v44  ;;  %v2580_v29 = vadd.f32 %v4150_v25, %v2579_v45 }
 0x706   : > { %v2530_v48 = vpop.f32.mrb[54].mxu0  ;;  %v2582_v49 = vpop.f32.mrb[54].mxu1 }
 0x707   : > { %v4545_v50 = vpop.f32.mrb[55].mxu0  ;;  %v4553_v51 = vpop.f32.mrb[55].mxu1  ;;  %v3104_v30 = vpack.c.bf16 %v2528_v28, %v2528_v28  ;;  %v3105_v31 = vpack.c.bf16 %v2580_v29, %v2580_v29 }
 0x70c   : > { %v2679_v54 = vpop.f32.mrb[56].mxu0  ;;  %v2731_v41 = vpop.f32.mrb[56].mxu1 }
 0x70d   : > { %v2680_v55 = vadd.f32 %v4163_v52, %v2679_v54  ;;  %v2732_v42 = vadd.f32 %v4164_v53, %v2731_v41  ;;  %v4560_v56 = vpop.f32.mrb[57].mxu0  ;;  %v4568_v57 = vpop.f32.mrb[57].mxu1 }
 0x70e   : > { %v2682_v58 = vpop.f32.mrb[58].mxu0  ;;  %v2734_v59 = vpop.f32.mrb[58].mxu1  ;;  %v889_v56 = vld [vmem:[%s881_s11] sm:$0xff] }
 0x70f   : > { %v3106_v60 = vpack.c.bf16 %v2680_v55, %v2680_v55  ;;  %v3107_v7 = vpack.c.bf16 %v2732_v42, %v2732_v42  ;;  %v4561_v61 = vpop.f32.mrb[59].mxu0  ;;  %v4569_v62 = vpop.f32.mrb[59].mxu1  ;;  %vm890_vm5 = vcmp.eq.f32.partialorder %v889_v56, 0.0 }
 0x710   : > { %v891_v59 = vsel %vm890_vm5, -1e+30, %v4907_v1 }
 0x711   : > { %v3114_v2 = vsel %vm1666_vm2, %v3106_v60, 0  ;;  %v3160_v3 = vsel %vm1666_vm2, %v3107_v7, 0 }
 0x712   : > { %4619 = vmatpush3.bf16.xpose.msra.mxu0 %v3114_v2  ;;  %4625 = vmatpush3.bf16.xpose.msra.mxu1 %v3160_v3 }
 0x713   : > { %4630 = vmatprep.subr.bf16.mxu0 %v4907_v1  ;;  %4636 = vmatprep.subr.bf16.mxu1 %v4907_v1 }
 0x714   : > { %v2783_v10 = vpop.f32.mrb[60].mxu0  ;;  %v2835_v11 = vpop.f32.mrb[60].mxu1 }
 0x715   : > { %v2784_v12 = vadd.f32 %v4165_v4, %v2783_v10  ;;  %v2836_v13 = vadd.f32 %v4166_v5, %v2835_v11  ;;  %v4576_v14 = vpop.f32.mrb[61].mxu0  ;;  %v4584_v15 = vpop.f32.mrb[61].mxu1 }
 0x716   : > { %v2786_v16 = vpop.f32.mrb[62].mxu0  ;;  %v2838_v17 = vpop.f32.mrb[62].mxu1 }
 0x717   : > { %v3108_v20 = vpack.c.bf16 %v2784_v12, %v2784_v12  ;;  %v3109_v21 = vpack.c.bf16 %v2836_v13, %v2836_v13  ;;  %v4577_v22 = vpop.f32.mrb[63].mxu0  ;;  %v4585_v23 = vpop.f32.mrb[63].mxu1 }
 0x719   : > { %v3206_v26 = vsel %vm1666_vm2, %v3108_v20, 0  ;;  %v3252_v27 = vsel %vm1666_vm2, %v3109_v21, 0  ;;  %4621 = vmatmul.mubr.msk.bf16.vlgmr.msra.gmra.mrb[72].mxu0 %vm1666_vm2, %v3102_v18  ;;  %4627 = vmatmul.mubr.msk.bf16.vlgmr.msra.gmra.mrb[72].mxu1 %vm1666_vm2, %v3103_v19 }
 0x71a   : > { %4631 = vmatpush3.bf16.xpose.msra.mxu0 %v3206_v26  ;;  %4637 = vmatpush3.bf16.xpose.msra.mxu1 %v3252_v27 }
 0x71b   : > { %4632 = vmatprep.mubr.msk.bf16.mxu0 %vm4908_vm0, %v4907_v1  ;;  %4638 = vmatprep.mubr.msk.bf16.mxu1 %vm4908_vm0, %v4907_v1 }
 0x71c   : > { %4642 = vmatprep.subr.bf16.mxu0 %v4907_v1  ;;  %4648 = vmatprep.subr.bf16.mxu1 %v4907_v1  ;;  %v2935_v33 = vpop.f32.mrb[64].mxu0 }
 0x71d   : > { %v2936_v35 = vadd.f32 %v4179_v32, %v2935_v33  ;;  %v4592_v36 = vpop.f32.mrb[65].mxu0 }
 0x71e   : > { %v2938_v37 = vpop.f32.mrb[66].mxu0  ;;  %v2987_v38 = vpop.f32.mrb[64].mxu1 }
 0x71f   : > { %v3350_v39 = vpack.c.bf16 %v2936_v35, %v2936_v35  ;;  %v2988_v40 = vadd.f32 %v4180_v34, %v2987_v38  ;;  %v4593_v43 = vpop.f32.mrb[67].mxu0  ;;  %v4600_v44 = vpop.f32.mrb[65].mxu1 }
 0x720   : > { %v2990_v45 = vpop.f32.mrb[66].mxu1 }
 0x721   : > { %4633 = vmatmul.mubr.msk.bf16.vlgmr.msra.gmra.mrb[76].mxu0 %vm1666_vm2, %v3104_v30  ;;  %4639 = vmatmul.mubr.msk.bf16.vlgmr.msra.gmra.mrb[76].mxu1 %vm1666_vm2, %v3105_v31  ;;  %v3358_v46 = vsel %vm1914_vm3, %v3350_v39, 0  ;;  %v3351_v47 = vpack.c.bf16 %v2988_v40, %v2988_v40  ;;  %v4601_v48 = vpop.f32.mrb[67].mxu1 }
 0x722   : > { %4644 = vmatprep.mubr.msk.bf16.mxu0 %vm4908_vm0, %v4907_v1  ;;  %4650 = vmatprep.mubr.msk.bf16.mxu1 %vm4908_vm0, %v4907_v1  ;;  %v4182_v48 = vld [vmem:[%s5793_s16 + $0x3] ss:$0 sm:$0xff] }
 0x723   : > { %4643 = vmatpush3.bf16.msra.mxu0 %v3358_v46  ;;  %v3404_v49 = vsel %vm1914_vm3, %v3351_v47, 0 }
 0x724   : > { %4654 = vmatprep.subr.bf16.mxu0 %v4907_v1  ;;  %4649 = vmatpush3.bf16.msra.mxu1 %v3404_v49  ;;  %v5603_v50 = vpop.f32.mrb[68].mxu0  ;;  %v4181_v49 = vld [vmem:[%s5793_s16 + $0x2] ss:$0 sm:$0xff] }
 0x725   : > { %4660 = vmatprep.subr.bf16.mxu1 %v4907_v1  ;;  %v4608_v52 = vpop.f32.mrb[69].mxu0 }
 0x726   : > { %v5605_v51 = vpop.f32.mrb[68].mxu1  ;;  %v3042_v54 = vpop.f32.mrb[70].mxu0 }
 0x727   : > { %v4616_v53 = vpop.f32.mrb[69].mxu1  ;;  %v4609_v55 = vpop.f32.mrb[71].mxu0  ;;  %v3092_v52 = vadd.f32 %v4182_v48, %v5605_v51  ;;  %v3040_v54 = vadd.f32 %v4181_v49, %v5603_v50 }
 0x728   : > { %v3094_v41 = vpop.f32.mrb[70].mxu1 }
 0x729   : > { %v4617_v42 = vpop.f32.mrb[71].mxu1  ;;  %v3353_v56 = vpack.c.bf16 %v3092_v52, %v3092_v52 }
 0x7ec   : > { %v3150_v57 = vpop.f32.mrb[72].mxu0  ;;  %v3196_v58 = vpop.f32.mrb[72].mxu1 }
 0x7ed   : > { %v3294_v60 = vmul.f32 0.35355338, %v3150_v57  ;;  %v3295_v7 = vmul.f32 0.35355338, %v3196_v58  ;;  %v4622_v61 = vpop.f32.mrb[73].mxu0  ;;  %v4628_v62 = vpop.f32.mrb[73].mxu1  ;;  %v3352_v58 = vpack.c.bf16 %v3040_v54, %v3040_v54 }
 0x7ee   : > { %v3153_v63 = vpop.f32.mrb[74].mxu0  ;;  %v3199_v0 = vpop.f32.mrb[74].mxu1  ;;  %v3496_v61 = vsel %vm1914_vm3, %v3353_v56, 0  ;;  %v3098_v62 = vld [vmem:[%s5794_s17 + $0x4] sm:$0xf] }
 0x7ef   : > { %v4623_v2 = vpop.f32.mrb[75].mxu0  ;;  %v4629_v3 = vpop.f32.mrb[75].mxu1  ;;  %v3299_v4 = vadd.f32 %v3295_v7, %v891_v59  ;;  %v3298_v5 = vadd.f32 %v3294_v60, %v891_v59  ;;  %v3450_v51 = vsel %vm1914_vm3, %v3352_v58, 0  ;;  %v4207_v56 = vld [vmem:[%s5795_s18] ss:$0 sm:$0xff] }
 0x7f0   : > { %v3097_v2 = vld [vmem:[%s5794_s17] sm:$0xf] }
 0x7f1   : > { %v3305_v6 = vsel %vm1666_vm2, %v3299_v4, -inf  ;;  %v3302_v9 = vsel %vm1666_vm2, %v3298_v5, -inf }
 0x7f2   : > { %3306 = vmax.xlane.f32.xlu1 %v3305_v6  ;;  %3303 = vmax.xlane.f32.xlu0 %v3302_v9  ;;  %v3546_v9 = vsel %vm1914_vm3, %v3097_v2, 0  ;;  %v4799_v2 = vld [vmem:[%s5798_s21] sm:$0xff]  }
 0x7f4   : > { %v3242_v10 = vpop.f32.mrb[76].mxu0  ;;  %v3288_v11 = vpop.f32.mrb[76].mxu1 }
 0x7f5   : > { %v3296_v12 = vmul.f32 0.35355338, %v3242_v10  ;;  %v3297_v13 = vmul.f32 0.35355338, %v3288_v11  ;;  %v4634_v14 = vpop.f32.mrb[77].mxu0  ;;  %v4640_v15 = vpop.f32.mrb[77].mxu1 }
 0x7f6   : > { %v3245_v16 = vpop.f32.mrb[78].mxu0  ;;  %v3291_v17 = vpop.f32.mrb[78].mxu1  ;;  %v3100_v10 = vld [vmem:[%s5794_s17 + $0xc] sm:$0xf]  ;;  %v3099_v11 = vld [vmem:[%s5794_s17 + $0x8] sm:$0xf] }
 0x7f7   : > { %v4635_v18 = vpop.f32.mrb[79].mxu0  ;;  %v4641_v19 = vpop.f32.mrb[79].mxu1  ;;  %v3301_v20 = vadd.f32 %v3297_v13, %v891_v59  ;;  %v3300_v21 = vadd.f32 %v3296_v12, %v891_v59  ;;  %v3684_v16 = vsel %vm1914_vm3, %v3100_v10, 0 }
 0x7f9   : > { %v3311_v22 = vsel %vm1666_vm2, %v3301_v20, -inf  ;;  %v3308_v23 = vsel %vm1666_vm2, %v3300_v21, -inf }
 0x7fa   : > { %3312 = vmax.xlane.f32.xlu1 %v3311_v22  ;;  %3309 = vmax.xlane.f32.xlu0 %v3308_v23 }
 0x87f   : > { %v3307_v24 = vpop.xlane.xlu1 %3306  ;;  %v3304_v25 = vpop.xlane.xlu0 %3303 }
 0x880   : > { %v3315_v26 = vsub.f32 %v3299_v4, %v3307_v24  ;;  %v3314_v27 = vsub.f32 %v3298_v5, %v3304_v25  ;;  %v3592_v5 = vsel %vm1914_vm3, %v3098_v62, 0 }
 0x882   : > { %v3320_v28 = vmul.f32 1.442695, %v3315_v26  ;;  %v3318_v29 = vmul.f32 1.442695, %v3314_v27 }
 0x884   : > { %4823 = vpow2.f32 %v3320_v28 }
 0x885   : > { %4825 = vpow2.f32 %v3318_v29 }
 0x887   : > { %v3313_v30 = vpop.xlane.xlu1 %3312  ;;  %v3310_v31 = vpop.xlane.xlu0 %3309 }
 0x888   : > { %v3317_v32 = vsub.f32 %v3301_v20, %v3313_v30  ;;  %v3316_v33 = vsub.f32 %v3300_v21, %v3310_v31  ;;  %v3638_v20 = vsel %vm1914_vm3, %v3099_v11, 0  ;;  %v4208_v11 = vld [vmem:[%s5796_s19] ss:$0 sm:$0xff] }
 0x88a   : > { %v3324_v34 = vmul.f32 1.442695, %v3317_v32  ;;  %v3322_v35 = vmul.f32 1.442695, %v3316_v33 }
 0x88c   : > { %4827 = vpow2.f32 %v3324_v34 }
 0x88d   : > { %4829 = vpow2.f32 %v3322_v35 }
 0x88e   : > { %v4824_v36 = vpop.eup %4823 }
 0x88f   : > { %v4826_v37 = vpop.eup %4825  ;;  %v3329_v38 = vsel %vm1666_vm2, %v4824_v36, 0.0 }
 0x890   : > { %3330 = vadd.xlane.f32.xlu1 %v3329_v38  ;;  %v3326_v39 = vsel %vm1666_vm2, %v4826_v37, 0.0 }
 0x891   : > { %3327 = vadd.xlane.f32.xlu0 %v3326_v39 }
 0x896   : > { %v4828_v40 = vpop.eup %4827 }
 0x897   : > { %v4830_v43 = vpop.eup %4829  ;;  %v3335_v44 = vsel %vm1666_vm2, %v4828_v40, 0.0 }
 0x898   : > { %3336 = vadd.xlane.f32.xlu1 %v3335_v44  ;;  %v3332_v45 = vsel %vm1666_vm2, %v4830_v43, 0.0 }
 0x899   : > { %3333 = vadd.xlane.f32.xlu0 %v3332_v45 }
 0x91d   : > { %v3331_v46 = vpop.xlane.xlu1 %3330 }
 0x91e   : > { %4831 = vrcp.f32 %v3331_v46  ;;  %v3328_v47 = vpop.xlane.xlu0 %3327 }
 0x91f   : > { %4833 = vrcp.f32 %v3328_v47 }
 0x925   : > { %v3337_v53 = vpop.xlane.xlu1 %3336 }
 0x926   : > { %4835 = vrcp.f32 %v3337_v53  ;;  %v3334_v41 = vpop.xlane.xlu0 %3333 }
 0x927   : > { %4837 = vrcp.f32 %v3334_v41 }
 0x928   : > { %v4832_v55 = vpop.eup %4831 }
 0x929   : > { %v4834_v42 = vpop.eup %4833  ;;  %v3343_v57 = vmul.f32 %v4832_v55, %v4824_v36 }
 0x92a   : > { %v3342_v59 = vmul.f32 %v4834_v42, %v4826_v37 }
 0x92b   : > { %v3347_v60 = vpack.c.bf16 %v3343_v57, %v3343_v57 }
 0x92c   : > { %v3346_v7 = vpack.c.bf16 %v3342_v59, %v3342_v59 }
 0x92d   : > { %4651 = vmatmul.mubr.msk.bf16.vlgmr.msra.gmra.mrb[80].mxu1 %vm1666_vm2, %v3347_v60 }
 0x92e   : > { %4645 = vmatmul.mubr.msk.bf16.vlgmr.msra.gmra.mrb[80].mxu0 %vm1666_vm2, %v3346_v7  ;;  %4661 = vmatpush3.bf16.msra.mxu1 %v3496_v61 }
 0x92f   : > { %4655 = vmatpush3.bf16.msra.mxu0 %v3450_v51  ;;  %4656 = vmatprep.mubr.msk.bf16.mxu0 %vm4908_vm0, %v4907_v1 }
 0x930   : > { %v4836_v50 = vpop.eup %4835  ;;  %4662 = vmatprep.mubr.msk.bf16.mxu1 %vm4908_vm0, %v4907_v1  ;;  %4666 = vmatprep.subr.bf16.mxu0 %v4907_v1 }
 0x931   : > { %v4838_v63 = vpop.eup %4837  ;;  %v3345_v0 = vmul.f32 %v4836_v50, %v4828_v40  ;;  %4672 = vmatprep.subr.bf16.mxu1 %v4907_v1 }
 0x932   : > { %v3344_v3 = vmul.f32 %v4838_v63, %v4830_v43 }
 0x933   : > { %v3349_v4 = vpack.c.bf16 %v3345_v0, %v3345_v0 }
 0x934   : > { %v3348_v6 = vpack.c.bf16 %v3344_v3, %v3344_v3  ;;  %v4800_v3 = vld [vmem:[%s5798_s21 + $0x8] sm:$0xff]  }
 0x935   : > { %4663 = vmatmul.mubr.msk.bf16.vlgmr.msra.gmra.mrb[84].mxu1 %vm1666_vm2, %v3349_v4  ;;  %v4802_v4 = vld [vmem:[%s5800_s23 + $0x8] sm:$0xff]  }
 0x936   : > { %4657 = vmatmul.mubr.msk.bf16.vlgmr.msra.gmra.mrb[84].mxu0 %vm1666_vm2, %v3348_v6  ;;  %4673 = vmatpush3.bf16.msra.mxu1 %v3592_v5 }
 0x937   : > { %4667 = vmatpush3.bf16.msra.mxu0 %v3546_v9  ;;  %4668 = vmatprep.mubr.msk.bf16.mxu0 %vm4908_vm0, %v4907_v1 }
 0x938   : > { %4674 = vmatprep.mubr.msk.bf16.mxu1 %vm4908_vm0, %v4907_v1  ;;  %4678 = vmatprep.subr.bf16.mxu0 %v4907_v1 }
 0x939   : > { %4684 = vmatprep.subr.bf16.mxu1 %v4907_v1 }
 0xa00   : > { %v3440_v12 = vpop.f32.mrb[80].mxu1 }
 0xa01   : > { %v3394_v13 = vpop.f32.mrb[80].mxu0  ;;  %v3539_v14 = vpack.c.bf16 %v3440_v12, %v3440_v12  ;;  %v4652_v15 = vpop.f32.mrb[81].mxu1 }
 0xa02   : > { %v3538_v17 = vpack.c.bf16 %v3394_v13, %v3394_v13  ;;  %v4646_v18 = vpop.f32.mrb[81].mxu0  ;;  %v3443_v19 = vpop.f32.mrb[82].mxu1  ;;  %v4209_v13 = vld [vmem:[%s5797_s20] ss:$0 sm:$0xff] }
 0xa03   : > { %v3397_v21 = vpop.f32.mrb[82].mxu0  ;;  %v4653_v22 = vpop.f32.mrb[83].mxu1  ;;  %4675 = vmatmul.mubr.msk.bf16.vlgmr.msra.gmra.mrb[88].mxu1 %vm1666_vm2, %v3539_v14  ;;  %v4804_v18 = vld [vmem:[%s5800_s23 + $0x18] sm:$0xff]   ;;  %v4210_v19 = vld [vmem:[%s5799_s22] ss:$0 sm:$0xff] }
 0xa04   : > { %v4647_v23 = vpop.f32.mrb[83].mxu0  ;;  %4669 = vmatmul.mubr.msk.bf16.vlgmr.msra.gmra.mrb[88].mxu0 %vm1666_vm2, %v3538_v17  ;;  %4685 = vmatpush3.bf16.msra.mxu1 %v3684_v16  ;;  %v4803_v17 = vld [vmem:[%s5800_s23 + $0x10] sm:$0xff]  }
 0xa05   : > { %4679 = vmatpush3.bf16.msra.mxu0 %v3638_v20  ;;  %4680 = vmatprep.mubr.msk.bf16.mxu0 %vm4908_vm0, %v4907_v1 }
 0xa06   : > { %4686 = vmatprep.mubr.msk.bf16.mxu1 %vm4908_vm0, %v4907_v1  ;;  %4690 = vmatprep.subr.bf16.mxu0 %v4907_v1 }
 0xa07   : > { %4698 = vmatprep.subr.bf16.mxu1 %v4907_v1 }
 0xa08   : > { %v3532_v24 = vpop.f32.mrb[84].mxu1 }
 0xa09   : > { %v3486_v25 = vpop.f32.mrb[84].mxu0  ;;  %v3541_v26 = vpack.c.bf16 %v3532_v24, %v3532_v24  ;;  %v4664_v27 = vpop.f32.mrb[85].mxu1 }
 0xa0a   : > { %v3540_v28 = vpack.c.bf16 %v3486_v25, %v3486_v25  ;;  %v4658_v29 = vpop.f32.mrb[85].mxu0  ;;  %v3535_v30 = vpop.f32.mrb[86].mxu1 }
 0xa0b   : > { %v3489_v31 = vpop.f32.mrb[86].mxu0  ;;  %v4665_v32 = vpop.f32.mrb[87].mxu1  ;;  %4687 = vmatmul.mubr.msk.bf16.vlgmr.msra.gmra.mrb[92].mxu1 %vm1666_vm2, %v3541_v26 }
 0xa0c   : > { %v4659_v33 = vpop.f32.mrb[87].mxu0  ;;  %4681 = vmatmul.mubr.msk.bf16.vlgmr.msra.gmra.mrb[92].mxu0 %vm1666_vm2, %v3540_v28  ;;  %4706 = vmatprep.mubr.msk.bf16.mxu1 %vm4908_vm0, %v4907_v1 }
 0xa0d   : > { %4694 = vmatprep.mubr.msk.bf16.mxu0 %vm4908_vm0, %v4907_v1  ;;  %4691 = vmatpush3.bf16.msra.mxu0 %v4799_v2 }
 0xa0e   : > { %4692 = vmatprep.subr.bf16.mxu0 %v4907_v1 }
 0xa11   : > { %4693 = vmatpush3.bf16.msra.mxu0 %v4800_v3 }
 0xad6   : > { %v3628_v34 = vpop.f32.mrb[88].mxu1 }
 0xad7   : > { %v3582_v35 = vpop.f32.mrb[88].mxu0  ;;  %v3727_v36 = vsel %vm1037_vm1, %v3628_v34, 0.0  ;;  %v4676_v37 = vpop.f32.mrb[89].mxu1 }
 0xad8   : > { %v3726_v38 = vsel %vm1037_vm1, %v3582_v35, 0.0  ;;  %v4670_v39 = vpop.f32.mrb[89].mxu0  ;;  %v3631_v40 = vpop.f32.mrb[90].mxu1 }
 0xad9   : > { %v3728_v43 = vadd.f32 %v3727_v36, %v3726_v38  ;;  %v3585_v44 = vpop.f32.mrb[90].mxu0  ;;  %v4677_v45 = vpop.f32.mrb[91].mxu1 }
 0xada   : > { %v4671_v46 = vpop.f32.mrb[91].mxu0  ;;  %v4220_v45 = vld [vmem:[%s5802_s25] ss:$0 sm:$0xff] }
 0xade   : > { %v3720_v47 = vpop.f32.mrb[92].mxu1 }
 0xadf   : > { %v3674_v48 = vpop.f32.mrb[92].mxu0  ;;  %v4688_v49 = vpop.f32.mrb[93].mxu1  ;;  %v3731_v57 = vsel %vm1037_vm1, %v3720_v47, 0.0  ;;  %v4221_v47 = vld [vmem:[%s5803_s26] ss:$0 sm:$0xff] }
 0xae0   : > { %v3729_v52 = vsel %vm1037_vm1, %v3674_v48, 0.0  ;;  %v4682_v53 = vpop.f32.mrb[93].mxu0  ;;  %v3723_v54 = vpop.f32.mrb[94].mxu1 }
 0xae1   : > { %v3730_v41 = vadd.f32 %v3729_v52, %v3728_v43  ;;  %v3677_v55 = vpop.f32.mrb[94].mxu0  ;;  %v4689_v42 = vpop.f32.mrb[95].mxu1 }
 0xae2   : > { %v4683_v58 = vpop.f32.mrb[95].mxu0 }
 0xae3   : > { %v3732_v59 = vadd.f32 %v3731_v57, %v3730_v41 }
 0xae5   : > { %v3739_v60 = vadd.f32 %v4207_v56, %v3732_v59 }
 0xae7   : > { %v3740_v7 = vadd.f32 %v3739_v60, %v5421_v8  ;;  %v4801_v8 = vld [vmem:[%s5800_s23] sm:$0xff]  }
 0xae8   : > { %4699 = vmatpush3.bf16.msra.mxu1 %v4801_v8 }
 0xae9   : > { %v3743_v61 = vsel %vm1037_vm1, %v3740_v7, 0.0  ;;  %4700 = vmatprep.subr.bf16.mxu1 %v4907_v1 }
 0xaea   : > { %3744 = vadd.xlane.f32.xlu0 %v3743_v61 }
 0xaec   : > { %4701 = vmatpush3.bf16.msra.mxu1 %v4802_v4 }
 0xaed   : > { %4702 = vmatprep.subr.bf16.mxu1 %v4907_v1 }
 0xaf0   : > { %4703 = vmatpush3.bf16.msra.mxu1 %v4803_v17 }
 0xaf1   : > { %4704 = vmatprep.subr.bf16.mxu1 %v4907_v1  ;;  %v4214_v1 = vld [vmem:[%s5801_s24] ss:$0 sm:$0xff] }
 0xaf4   : > { %4705 = vmatpush3.bf16.msra.mxu1 %v4804_v18 }
 0xb77   : > { %v3745_v51 = vpop.xlane.xlu0 %3744 }
 0xb78   : > { %v3746_v50 = vmul.f32 0.03125, %v3745_v51 }
 0xb7a   : > { %v3747_v62 = vsub.f32 %v3740_v7, %v3746_v50 }
 0xb7c   : > { %v3748_v63 = vmul.f32 %v3747_v62, %v3747_v62 }
 0xb7e   : > { %v3749_v0 = vsel %vm1037_vm1, %v3748_v63, 0.0 }
 0xb7f   : > { %3750 = vadd.xlane.f32.xlu1 %v3749_v0 }
 0xc0c   : > { %v3751_v5 = vpop.xlane.xlu1 %3750 }
 0xc0d   : > { %v3752_v6 = vmul.f32 0.03125, %v3751_v5 }
 0xc0f   : > { %v3753_v9 = vadd.f32 1e-06, %v3752_v6 }
 0xc11   : > { %4839 = vrsqrt.f32 %v3753_v9 }
 0xc1b   : > { %v4840_v10 = vpop.eup %4839 }
 0xc1c   : > { %v3755_v12 = vmul.f32 %v4840_v10, %v3747_v62 }
 0xc1e   : > { %v3762_v14 = vmul.f32 %v4208_v11, %v3755_v12 }
 0xc20   : > { %v3769_v15 = vadd.f32 %v4209_v13, %v3762_v14 }
 0xc22   : > { %v3770_v16 = vpack.c.bf16 %v3769_v15, %v3769_v15 }
 0xc24   : > { %4695 = vmatmul.mubr.msk.bf16.vlgmr.msra.gmra.mrb[96].mxu0 %vm1037_vm1, %v3770_v16 }
 0xcf7   : > { %v3831_v20 = vpop.f32.mrb[96].mxu0 }
 0xcf8   : > { %v3832_v21 = vadd.f32 %v4210_v19, %v3831_v20  ;;  %v4696_v22 = vpop.f32.mrb[97].mxu0 }
 0xcf9   : > { %v3834_v23 = vpop.f32.mrb[98].mxu0 }
 0xcfa   : > { %v3837_v24 = vmax.f32 %v3832_v21, 0.0  ;;  %v4697_v25 = vpop.f32.mrb[99].mxu0 }
 0xcfc   : > { %v3838_v26 = vpack.c.bf16 %v3837_v24, %v3837_v24 }
 0xcfe   : > { %4707 = vmatmul.mubr.msk.bf16.vlgmr.msra.gmra.mrb[96].mxu1 %vm3878_vm6, %v3838_v26 }
 0xdd1   : > { %v3916_v27 = vpop.f32.mrb[96].mxu1 }
 0xdd2   : > { %v3917_v28 = vadd.f32 %v4214_v1, %v3916_v27  ;;  %v4708_v29 = vpop.f32.mrb[97].mxu1 }
 0xdd3   : > { %v3919_v30 = vpop.f32.mrb[98].mxu1 }
 0xdd4   : > { %v4709_v31 = vpop.f32.mrb[99].mxu1  ;;  %v3922_v32 = vadd.f32 %v3917_v28, %v3769_v15 }
 0xdd6   : > { %v3925_v33 = vsel %vm1037_vm1, %v3922_v32, 0.0 }
 0xdd7   : > { %3926 = vadd.xlane.f32.xlu0 %v3925_v33 }
 0xe64   : > { %v3927_v34 = vpop.xlane.xlu0 %3926 }
 0xe65   : > { %v3928_v35 = vmul.f32 0.03125, %v3927_v34 }
 0xe67   : > { %v3929_v36 = vsub.f32 %v3922_v32, %v3928_v35 }
 0xe69   : > { %v3930_v37 = vmul.f32 %v3929_v36, %v3929_v36 }
 0xe6b   : > { %v3931_v38 = vsel %vm1037_vm1, %v3930_v37, 0.0 }
 0xe6c   : > { %3932 = vadd.xlane.f32.xlu1 %v3931_v38 }
 0xef9   : > { %v3933_v39 = vpop.xlane.xlu1 %3932 }
 0xefa   : > { %v3934_v40 = vmul.f32 0.03125, %v3933_v39 }
 0xefc   : > { %v3935_v43 = vadd.f32 1e-06, %v3934_v40 }
 0xefe   : > { %4841 = vrsqrt.f32 %v3935_v43 }
 0xf08   : > { %v4842_v44 = vpop.eup %4841 }
 0xf09   : > { %v3937_v46 = vmul.f32 %v4842_v44, %v3929_v36 }
 0xf0b   : > { %v3944_v48 = vmul.f32 %v4220_v45, %v3937_v46 }
 0xf0d   : > { %v3951_v49 = vadd.f32 %v4221_v47, %v3944_v48 }
 0xf0f   : > { %3952 = vst.msk [vmem:[%s861_s6] sm:$0xff] %vm1037_vm1, %v3951_v49 }
 0xf10   : > { %4856 = shalt.err (!%p4853_p3)
}
 0xf11   : > { %s4857_s8 = scalar_lea.hbm %s5734_s0, 128  ;;  %s4861_s6 = scalar_lea.hbm %s5804_s27, 256 }
 0xf12   : > { %p4858_p4 = scmp.ne.s32.totalorder %s5734_s0, %s4857_s8  ;;  %p4862_p9 = scmp.lt.u32.totalorder %s5734_s0, %s5804_s27 }
 0xf13   : > { %p4863_p10 = scmp.lt.u32.totalorder %s4861_s6, %s4857_s8  ;;  %p4865_p12 = scmp.lt.u32.totalorder %s4857_s8, %s5734_s0 }
 0xf14   : > { %p4859_p7 = pnand %p4858_p4, %p5088_p5 }
 0xf15   : > { %p4864_p11 = por %p4863_p10, %p4862_p9 }
 0xf16   : > { %p4860_p8 = pneg %p4859_p7 }
 0xf17   : > { %p4866_p13 = por %p4865_p12, %p4864_p11 }
 0xf19   : > { %p4867_p0 = pnand %p4866_p13, %p4860_p8 }
 0xf1b   : > { %4870 = shalt.err (!%p4867_p0)
}
 0xf1c   : > { %4710 = dma.vmem_to_hbm [thread:$0]  (%p5088_p5), %s5736_s2, 128, %s5734_s0, %s3954_s7  }
 0xf1d PF: > { %s5852_s5 = sld [smem:[#allocation7_spill]]  ;;  %s5853_s9 = sld [smem:[#allocation5_spill]] }
 0xf23   : > { %p4716_p1 = scmp.ge.s32.totalorder %s5852_s5, 2  ;;  %s3979_s10 = sand.u32 1, %s5853_s9  }
 0xf24   : > { %s3980_s3 = scalar_lea.sflag [#allocation3], %s3979_s10 }
 0xf25   : > { %p4713_p2 = pnand %p4716_p1, %p5092_p6 }
 0xf27   : > { %4888 = dma.done.wait (!%p4713_p2), %s3980_s3, 128  }
 0xf28   : > { %4890 = vsyncadd (!%p4713_p2), %s3980_s3, 4294967168  ;;  %s5855_s30 = sld [smem:[#allocation8_spill]]  ;;  %s5856_s8 = sld [smem:[#allocation6_spill]] }
 0xf29   : > { %s5857_s6 = sld [smem:[#allocation9_spill]]  ;;  %s5858_s7 = smov %s4897_s4 }
 0xf2e   : > { %p37_p3 = scmp.ge.s32.totalorder %s5855_s30, 4   ;;  %s5859_s4 = smov %s5856_s8 }
 0xf2f   : > { %s5860_s8 = smov %s5857_s6 }
 0xf30   :  { %39 = sbr.rel (!%p37_p3) target bundleno = 16 (0x10), region = 175 }
 0xf37   :  { %3985 = vsyncpa [#allocation3], 1 }
 0xf38   :  { %3987 = vsyncpa [#allocation3 + $0x1], 1 }

</bundles_post_ra>
